<compile_context>
chip_gen: v5e
topology: v5e:2x2
jax: 0.10.0
libtpu: 0.0.40
codegen_flags: <defaults>
</compile_context>

<pallas_src>
import math
import jax
import jax.numpy as jnp
from jax.experimental import pallas as pl
from jax.experimental.pallas import tpu as pltpu

B = 2            # batch
T = 8            # config.block_size
DIN = 64         # config.input_dim
E = 256          # config.n_embd (must be 256: forward reshapes codes to (B, -1, 256))
DOUT = 64        # config.output_dim
K = 128          # config.quantize_codebook_size
COMMIT_W = 1.0   # config.quantize_commitment_weight
LN_EPS = 1e-5


def _slab_ln(s, gamma, beta):
    """nn.LayerNorm((T, F)) over one batch slab, two-pass variance."""
    mu = jnp.mean(s)
    c = s - mu
    var = jnp.mean(c * c)
    return c * jax.lax.rsqrt(var + LN_EPS) * gamma + beta


def face_tokenizer_kernel(
    x_ref, w1_ref, b1_ref, w2_ref, b2_ref, g1_ref, be1_ref,
    cbt_ref, cb2_ref, cbw3_hbm_ref, w4_hbm_ref, b4_ref, g2_ref, be2_ref,
    y_ref, loss_ref,
    cbw3_vmem, w4_vmem, dma_sem):
    f32 = jnp.float32

    # Kick off decoder-weight DMA (HBM -> VMEM scratch) before any compute so it
    # overlaps the encoder matmuls and the VQ nearest-neighbour search.
    cp_cbw3 = pltpu.make_async_copy(cbw3_hbm_ref, cbw3_vmem, dma_sem.at[0])
    cp_w4 = pltpu.make_async_copy(w4_hbm_ref, w4_vmem, dma_sem.at[1])
    cp_cbw3.start()
    cp_w4.start()

    x = x_ref[...]                                        # (B*T, DIN) f32

    # ---- encoder: Linear -> ReLU -> Linear -> ReLU -> LayerNorm((T, E)) ----
    h = jnp.maximum(
        jnp.dot(x, w1_ref[...].astype(f32), preferred_element_type=f32) + b1_ref[...], 0.0)
    h = jnp.maximum(
        jnp.dot(h, w2_ref[...].astype(f32), preferred_element_type=f32) + b2_ref[...], 0.0)
    g1, be1 = g1_ref[...], be1_ref[...]
    h = jnp.concatenate(
        [_slab_ln(h[b * T:(b + 1) * T, :], g1, be1) for b in range(B)], axis=0)  # (B*T, E)

    # ---- VQ: nearest codebook entry (squared-L2 argmin, ||h||^2 term dropped) ----
    hc = jnp.dot(h, cbt_ref[...].astype(f32), preferred_element_type=f32)   # (B*T, K)
    dist = cb2_ref[...] - 2.0 * hc                                          # (B*T, K)
    iota = jax.lax.broadcasted_iota(jnp.int32, dist.shape, 1)
    min_d = jnp.min(dist, axis=-1, keepdims=True)                           # (B*T, 1)
    idx = jnp.min(jnp.where(dist == min_d, iota, K), axis=-1, keepdims=True)  # first argmin
    onehot = (iota == idx).astype(f32)                                      # (B*T, K)

    # commitment loss, fully reduced in-kernel:
    #   sum(||h - code||^2) = sum(h^2) + sum(min_d)
    sse = jnp.sum(h * h) + jnp.sum(min_d)
    loss_ref[...] = jnp.broadcast_to(sse * (COMMIT_W / (B * T * E)), (1, 1))

    # codes.reshape(B, -1, 256) is the identity here since E == 256.
    # ---- decoder: Linear -> ReLU -> Linear -> ReLU -> LayerNorm((T, DOUT)) ----
    cp_cbw3.wait()
    cp_w4.wait()
    # First decoder matmul fused with the code lookup; b3 already folded into cb_w3.
    d1 = jnp.maximum(jnp.dot(onehot, cbw3_vmem[...], preferred_element_type=f32), 0.0)
    d2 = jnp.maximum(
        jnp.dot(d1, w4_vmem[...].astype(f32), preferred_element_type=f32) + b4_ref[...], 0.0)
    g2, be2 = g2_ref[...], be2_ref[...]
    for b in range(B):                                    # direct per-slab stores (no concat)
        y_ref[b * T:(b + 1) * T, :] = _slab_ln(d2[b * T:(b + 1) * T, :], g2, be2)


def face_tokenizer_forward(x, params):
    (w1, b1, w2, b2, g1, be1, cb, w3, b3, w4, b4, g2, be2) = params
    f32 = jnp.float32
    hi = jax.lax.Precision.HIGHEST

    # Constants of the weight set, hoisted out of the kernel (computed once at weight-load
    # time in a real model).
    cb_f32 = cb.astype(f32)
    cb_t = jnp.transpose(cb)                                          # (E, K) bf16 (lossless)
    cb_sqnorm = jnp.sum(cb_f32 * cb_f32, axis=-1).reshape(1, K)       # (1, K) f32
    cb_w3 = jnp.matmul(cb_f32, w3.astype(f32), precision=hi) + b3     # (K, E) f32, b3 folded

    x2 = x.reshape(B * T, DIN)

    vmem = pl.BlockSpec(memory_space=pltpu.MemorySpace.VMEM)
    hbm = pl.BlockSpec(memory_space=pl.ANY)
    in_specs = [
        vmem,              # x (flattened)
        vmem, vmem,        # enc W1 (bf16), b1
        vmem, vmem,        # enc W2 (bf16), b2
        vmem, vmem,        # enc LN gamma, beta
        vmem,              # codebook^T (E, K) bf16
        vmem,              # ||codebook||^2 (1, K)
        hbm,               # cb @ W3 + b3 (f32) -> manual DMA, overlapped with encoder
        hbm,               # dec W4 (bf16)     -> manual DMA, overlapped with encoder
        vmem,              # dec b4
        vmem, vmem,        # dec LN gamma, beta
    ]
    out_specs = (vmem, vmem)

    y2, loss = pl.pallas_call(
        face_tokenizer_kernel,
        in_specs=in_specs,
        out_specs=out_specs,
        out_shape=(jax.ShapeDtypeStruct((B * T, DOUT), f32),
                   jax.ShapeDtypeStruct((1, 1), f32)),
        scratch_shapes=[
            pltpu.VMEM((K, E), f32),            # cb_w3 landing buffer
            pltpu.VMEM((E, DOUT), jnp.bfloat16),  # w4 landing buffer
            pltpu.SemaphoreType.DMA((2,)),
        ],
    )(x2, w1, b1, w2, b2, g1, be1, cb_t, cb_sqnorm, cb_w3, w4, b4, g2, be2)

    y = y2.reshape(B, T, DOUT)
    return y, None, loss[0, 0]


def init_params(key):
    std = 0.02 / math.sqrt(2 * DOUT)          # matches _init_weights
    ks = jax.random.split(key, 6)
    bf16 = jnp.bfloat16
    w1 = (jax.random.normal(ks[0], (DIN, E), jnp.float32) * std).astype(bf16)
    b1 = jnp.zeros((1, E), jnp.float32)
    w2 = (jax.random.normal(ks[1], (E, E), jnp.float32) * std).astype(bf16)
    b2 = jnp.zeros((1, E), jnp.float32)
    g1 = jnp.ones((T, E), jnp.float32)
    be1 = jnp.zeros((T, E), jnp.float32)
    cb = jax.random.normal(ks[2], (K, E), jnp.float32).astype(bf16)   # deterministic VQ codebook
    w3 = (jax.random.normal(ks[3], (E, E), jnp.float32) * std).astype(bf16)
    b3 = jnp.zeros((1, E), jnp.float32)
    w4 = (jax.random.normal(ks[4], (E, DOUT), jnp.float32) * std).astype(bf16)
    b4 = jnp.zeros((1, DOUT), jnp.float32)
    g2 = jnp.ones((T, DOUT), jnp.float32)
    be2 = jnp.zeros((T, DOUT), jnp.float32)
    return (w1, b1, w2, b2, g1, be1, cb, w3, b3, w4, b4, g2, be2)


def reference_forward(x, params):
    (w1, b1, w2, b2, g1, be1, cb, w3, b3, w4, b4, g2, be2) = params
    f32 = jnp.float32
    hi = jax.lax.Precision.HIGHEST
    w1, w2, cb, w3, w4 = (w.astype(f32) for w in (w1, w2, cb, w3, w4))

    def ln(h, g, b):
        mu = jnp.mean(h, axis=(-2, -1), keepdims=True)
        var = jnp.mean((h - mu) ** 2, axis=(-2, -1), keepdims=True)
        return (h - mu) / jnp.sqrt(var + LN_EPS) * g + b

    h = jnp.maximum(jnp.matmul(x, w1, precision=hi) + b1, 0.0)
    h = jnp.maximum(jnp.matmul(h, w2, precision=hi) + b2, 0.0)
    h = ln(h, g1, be1)
    dist = jnp.sum(cb * cb, -1)[None, None, :] - 2.0 * jnp.einsum(
        "bte,ke->btk", h, cb, precision=hi)
    idx = jnp.argmin(dist, axis=-1)
    codes = cb[idx]                                   # (B, T, E)
    quant_loss = COMMIT_W * jnp.mean((h - codes) ** 2)
    c = codes.reshape(codes.shape[0], -1, 256)        # identity (E == 256)
    d1 = jnp.maximum(jnp.matmul(c, w3, precision=hi) + b3, 0.0)
    d2 = jnp.maximum(jnp.matmul(d1, w4, precision=hi) + b4, 0.0)
    y = ln(d2, g2, be2)
    return y, quant_loss


if __name__ == "__main__":
    key = jax.random.PRNGKey(0)
    kx, kp = jax.random.split(key)
    x = jax.random.normal(kx, (B, T, DIN), jnp.float32)
    params = init_params(kp)

    y, loss, quant_loss = face_tokenizer_forward(x, params)
    y = jax.block_until_ready(y)
    quant_loss = jax.block_until_ready(quant_loss)
    assert loss is None

    y_ref, ql_ref = reference_forward(x, params)
    assert jnp.allclose(y, y_ref, atol=1e-3, rtol=1e-3), "decoder output mismatch"
    assert jnp.allclose(quant_loss, ql_ref, atol=1e-4, rtol=1e-3), "quant loss mismatch"
    print("KERNEL_OK")
</pallas_src>

<mosaic_0001>
module attributes {stable_mosaic.version = 11 : i64} {
  func.func @face_tokenizer_kernel(%arg0: memref<16x64xf32, #tpu.memory_space<vmem>>, %arg1: memref<64x256xbf16, #tpu.memory_space<vmem>>, %arg2: memref<1x256xf32, #tpu.memory_space<vmem>>, %arg3: memref<256x256xbf16, #tpu.memory_space<vmem>>, %arg4: memref<1x256xf32, #tpu.memory_space<vmem>>, %arg5: memref<8x256xf32, #tpu.memory_space<vmem>>, %arg6: memref<8x256xf32, #tpu.memory_space<vmem>>, %arg7: memref<256x128xbf16, #tpu.memory_space<vmem>>, %arg8: memref<1x128xf32, #tpu.memory_space<vmem>>, %arg9: memref<128x256xf32, #tpu.memory_space<any>>, %arg10: memref<256x64xbf16, #tpu.memory_space<any>>, %arg11: memref<1x64xf32, #tpu.memory_space<vmem>>, %arg12: memref<8x64xf32, #tpu.memory_space<vmem>>, %arg13: memref<8x64xf32, #tpu.memory_space<vmem>>, %arg14: memref<16x64xf32, #tpu.memory_space<vmem>>, %arg15: memref<1x1xf32, #tpu.memory_space<vmem>>, %arg16: memref<128x256xf32, #tpu.memory_space<vmem>>, %arg17: memref<256x64xbf16, #tpu.memory_space<vmem>>, %arg18: memref<2x!tpu.dma_semaphore, #tpu.memory_space<semaphore_mem>>) attributes {dimension_semantics = [], scalar_prefetch = 0 : i64, scratch_operands = 3 : i64, tpu.core_type = #tpu.core_type<tc>} {
    %c0_i32 = arith.constant 0 : i32
    %0 = tpu.memref_slice %arg18[%c0_i32] : memref<2x!tpu.dma_semaphore, #tpu.memory_space<semaphore_mem>> -> memref<1x!tpu.dma_semaphore, #tpu.memory_space<semaphore_mem>>
    %1 = tpu.memref_squeeze %0 : memref<1x!tpu.dma_semaphore, #tpu.memory_space<semaphore_mem>> -> memref<!tpu.dma_semaphore, #tpu.memory_space<semaphore_mem>>
    tpu.enqueue_dma source(%arg9 : memref<128x256xf32, #tpu.memory_space<any>>) target(%arg16 : memref<128x256xf32, #tpu.memory_space<vmem>>) target_semaphore(%1 : memref<!tpu.dma_semaphore, #tpu.memory_space<semaphore_mem>>)
    %c1_i32 = arith.constant 1 : i32
    %2 = tpu.memref_slice %arg18[%c1_i32] : memref<2x!tpu.dma_semaphore, #tpu.memory_space<semaphore_mem>> -> memref<1x!tpu.dma_semaphore, #tpu.memory_space<semaphore_mem>>
    %3 = tpu.memref_squeeze %2 : memref<1x!tpu.dma_semaphore, #tpu.memory_space<semaphore_mem>> -> memref<!tpu.dma_semaphore, #tpu.memory_space<semaphore_mem>>
    tpu.enqueue_dma source(%arg10 : memref<256x64xbf16, #tpu.memory_space<any>>) target(%arg17 : memref<256x64xbf16, #tpu.memory_space<vmem>>) target_semaphore(%3 : memref<!tpu.dma_semaphore, #tpu.memory_space<semaphore_mem>>)
    %c0 = arith.constant 0 : index
    %c0_0 = arith.constant 0 : index
    %4 = vector.load %arg0[%c0, %c0_0] : memref<16x64xf32, #tpu.memory_space<vmem>>, vector<16x64xf32>
    %c0_1 = arith.constant 0 : index
    %c0_2 = arith.constant 0 : index
    %5 = vector.load %arg1[%c0_1, %c0_2] : memref<64x256xbf16, #tpu.memory_space<vmem>>, vector<64x256xbf16>
    %6 = arith.extf %5 : vector<64x256xbf16> to vector<64x256xf32>
    %cst = arith.constant dense<0.000000e+00> : vector<16x256xf32>
    %7 = tpu.matmul %4, %6, %cst {dimension_numbers = #tpu.dot_dimension_numbers<[1], [0], [0], [1], [0, 0, 1, 1], [], []>} : vector<16x64xf32>, vector<64x256xf32>, vector<16x256xf32> -> vector<16x256xf32>
    %c0_3 = arith.constant 0 : index
    %c0_4 = arith.constant 0 : index
    %8 = vector.load %arg2[%c0_3, %c0_4] : memref<1x256xf32, #tpu.memory_space<vmem>>, vector<1x256xf32>
    %9 = vector.broadcast %8 : vector<1x256xf32> to vector<16x256xf32>
    %10 = arith.addf %7, %9 : vector<16x256xf32>
    %cst_5 = arith.constant 0.000000e+00 : f32
    %11 = vector.broadcast %cst_5 : f32 to vector<16x256xf32>
    %12 = arith.maximumf %10, %11 : vector<16x256xf32>
    %c0_6 = arith.constant 0 : index
    %c0_7 = arith.constant 0 : index
    %13 = vector.load %arg3[%c0_6, %c0_7] : memref<256x256xbf16, #tpu.memory_space<vmem>>, vector<256x256xbf16>
    %14 = arith.extf %13 : vector<256x256xbf16> to vector<256x256xf32>
    %cst_8 = arith.constant dense<0.000000e+00> : vector<16x256xf32>
    %15 = tpu.matmul %12, %14, %cst_8 {dimension_numbers = #tpu.dot_dimension_numbers<[1], [0], [0], [1], [0, 0, 1, 1], [], []>} : vector<16x256xf32>, vector<256x256xf32>, vector<16x256xf32> -> vector<16x256xf32>
    %c0_9 = arith.constant 0 : index
    %c0_10 = arith.constant 0 : index
    %16 = vector.load %arg4[%c0_9, %c0_10] : memref<1x256xf32, #tpu.memory_space<vmem>>, vector<1x256xf32>
    %17 = vector.broadcast %16 : vector<1x256xf32> to vector<16x256xf32>
    %18 = arith.addf %15, %17 : vector<16x256xf32>
    %cst_11 = arith.constant 0.000000e+00 : f32
    %19 = vector.broadcast %cst_11 : f32 to vector<16x256xf32>
    %20 = arith.maximumf %18, %19 : vector<16x256xf32>
    %c0_12 = arith.constant 0 : index
    %c0_13 = arith.constant 0 : index
    %21 = vector.load %arg5[%c0_12, %c0_13] : memref<8x256xf32, #tpu.memory_space<vmem>>, vector<8x256xf32>
    %c0_14 = arith.constant 0 : index
    %c0_15 = arith.constant 0 : index
    %22 = vector.load %arg6[%c0_14, %c0_15] : memref<8x256xf32, #tpu.memory_space<vmem>>, vector<8x256xf32>
    %23 = vector.extract_strided_slice %20 {offsets = [0, 0], sizes = [8, 256], strides = [1, 1]} : vector<16x256xf32> to vector<8x256xf32>
    %24 = vector.shape_cast %23 : vector<8x256xf32> to vector<1x8x256xf32>
    %cst_16 = arith.constant dense<0.000000e+00> : vector<1xf32>
    %25 = vector.multi_reduction <add>, %24, %cst_16 [1, 2] : vector<1x8x256xf32> to vector<1xf32>
    %26 = vector.shape_cast %25 : vector<1xf32> to vector<1x1x1xf32>
    %27 = vector.extract %26[0, 0, 0] : f32 from vector<1x1x1xf32>
    %cst_17 = arith.constant 2.048000e+03 : f32
    %28 = arith.divf %27, %cst_17 : f32
    %29 = vector.broadcast %28 : f32 to vector<8x256xf32>
    %30 = arith.subf %23, %29 : vector<8x256xf32>
    %31 = arith.mulf %30, %30 : vector<8x256xf32>
    %32 = vector.shape_cast %31 : vector<8x256xf32> to vector<1x8x256xf32>
    %cst_18 = arith.constant dense<0.000000e+00> : vector<1xf32>
    %33 = vector.multi_reduction <add>, %32, %cst_18 [1, 2] : vector<1x8x256xf32> to vector<1xf32>
    %34 = vector.shape_cast %33 : vector<1xf32> to vector<1x1x1xf32>
    %35 = vector.extract %34[0, 0, 0] : f32 from vector<1x1x1xf32>
    %cst_19 = arith.constant 2.048000e+03 : f32
    %36 = arith.divf %35, %cst_19 : f32
    %cst_20 = arith.constant 9.99999974E-6 : f32
    %37 = arith.addf %36, %cst_20 : f32
    %38 = math.rsqrt %37 : f32
    %39 = vector.broadcast %38 : f32 to vector<8x256xf32>
    %40 = arith.mulf %30, %39 : vector<8x256xf32>
    %41 = arith.mulf %40, %21 : vector<8x256xf32>
    %42 = arith.addf %41, %22 : vector<8x256xf32>
    %43 = vector.extract_strided_slice %20 {offsets = [8, 0], sizes = [8, 256], strides = [1, 1]} : vector<16x256xf32> to vector<8x256xf32>
    %44 = vector.shape_cast %43 : vector<8x256xf32> to vector<1x8x256xf32>
    %cst_21 = arith.constant dense<0.000000e+00> : vector<1xf32>
    %45 = vector.multi_reduction <add>, %44, %cst_21 [1, 2] : vector<1x8x256xf32> to vector<1xf32>
    %46 = vector.shape_cast %45 : vector<1xf32> to vector<1x1x1xf32>
    %47 = vector.extract %46[0, 0, 0] : f32 from vector<1x1x1xf32>
    %cst_22 = arith.constant 2.048000e+03 : f32
    %48 = arith.divf %47, %cst_22 : f32
    %49 = vector.broadcast %48 : f32 to vector<8x256xf32>
    %50 = arith.subf %43, %49 : vector<8x256xf32>
    %51 = arith.mulf %50, %50 : vector<8x256xf32>
    %52 = vector.shape_cast %51 : vector<8x256xf32> to vector<1x8x256xf32>
    %cst_23 = arith.constant dense<0.000000e+00> : vector<1xf32>
    %53 = vector.multi_reduction <add>, %52, %cst_23 [1, 2] : vector<1x8x256xf32> to vector<1xf32>
    %54 = vector.shape_cast %53 : vector<1xf32> to vector<1x1x1xf32>
    %55 = vector.extract %54[0, 0, 0] : f32 from vector<1x1x1xf32>
    %cst_24 = arith.constant 2.048000e+03 : f32
    %56 = arith.divf %55, %cst_24 : f32
    %cst_25 = arith.constant 9.99999974E-6 : f32
    %57 = arith.addf %56, %cst_25 : f32
    %58 = math.rsqrt %57 : f32
    %59 = vector.broadcast %58 : f32 to vector<8x256xf32>
    %60 = arith.mulf %50, %59 : vector<8x256xf32>
    %61 = arith.mulf %60, %21 : vector<8x256xf32>
    %62 = arith.addf %61, %22 : vector<8x256xf32>
    %63 = tpu.concatenate %42, %62 in 0 : vector<8x256xf32>, vector<8x256xf32> -> vector<16x256xf32>
    %c0_26 = arith.constant 0 : index
    %c0_27 = arith.constant 0 : index
    %64 = vector.load %arg7[%c0_26, %c0_27] : memref<256x128xbf16, #tpu.memory_space<vmem>>, vector<256x128xbf16>
    %65 = arith.extf %64 : vector<256x128xbf16> to vector<256x128xf32>
    %cst_28 = arith.constant dense<0.000000e+00> : vector<16x128xf32>
    %66 = tpu.matmul %63, %65, %cst_28 {dimension_numbers = #tpu.dot_dimension_numbers<[1], [0], [0], [1], [0, 0, 1, 1], [], []>} : vector<16x256xf32>, vector<256x128xf32>, vector<16x128xf32> -> vector<16x128xf32>
    %c0_29 = arith.constant 0 : index
    %c0_30 = arith.constant 0 : index
    %67 = vector.load %arg8[%c0_29, %c0_30] : memref<1x128xf32, #tpu.memory_space<vmem>>, vector<1x128xf32>
    %cst_31 = arith.constant 2.000000e+00 : f32
    %68 = vector.broadcast %cst_31 : f32 to vector<16x128xf32>
    %69 = arith.mulf %68, %66 : vector<16x128xf32>
    %70 = vector.broadcast %67 : vector<1x128xf32> to vector<16x128xf32>
    %71 = arith.subf %70, %69 : vector<16x128xf32>
    %72 = tpu.iota {dimensions = array<i32: 1>} : vector<16x128xi32>
    %cst_32 = arith.constant dense<0x7F800000> : vector<16xf32>
    %73 = vector.multi_reduction <minimumf>, %71, %cst_32 [1] : vector<16x128xf32> to vector<16xf32>
    %74 = vector.shape_cast %73 : vector<16xf32> to vector<16x1xf32>
    %75 = vector.broadcast %74 : vector<16x1xf32> to vector<16x128xf32>
    %76 = arith.cmpf oeq, %71, %75 : vector<16x128xf32>
    %c128_i32 = arith.constant 128 : i32
    %77 = vector.broadcast %c128_i32 : i32 to vector<16x128xi32>
    %78 = arith.select %76, %72, %77 : vector<16x128xi1>, vector<16x128xi32>
    %cst_33 = arith.constant dense<2147483647> : vector<16xi32>
    %79 = vector.multi_reduction <minsi>, %78, %cst_33 [1] : vector<16x128xi32> to vector<16xi32>
    %80 = vector.shape_cast %79 : vector<16xi32> to vector<16x1xi32>
    %81 = vector.broadcast %80 : vector<16x1xi32> to vector<16x128xi32>
    %82 = arith.cmpi eq, %72, %81 : vector<16x128xi32>
    %83 = arith.extui %82 : vector<16x128xi1> to vector<16x128xi32>
    %84 = arith.sitofp %83 : vector<16x128xi32> to vector<16x128xf32>
    %85 = arith.mulf %63, %63 : vector<16x256xf32>
    %86 = vector.shape_cast %85 : vector<16x256xf32> to vector<1x16x256xf32>
    %cst_34 = arith.constant dense<0.000000e+00> : vector<1xf32>
    %87 = vector.multi_reduction <add>, %86, %cst_34 [1, 2] : vector<1x16x256xf32> to vector<1xf32>
    %88 = vector.shape_cast %87 : vector<1xf32> to vector<1x1x1xf32>
    %89 = vector.extract %88[0, 0, 0] : f32 from vector<1x1x1xf32>
    %90 = vector.shape_cast %74 : vector<16x1xf32> to vector<1x16x1xf32>
    %cst_35 = arith.constant dense<0.000000e+00> : vector<1xf32>
    %91 = vector.multi_reduction <add>, %90, %cst_35 [1, 2] : vector<1x16x1xf32> to vector<1xf32>
    %92 = vector.shape_cast %91 : vector<1xf32> to vector<1x1x1xf32>
    %93 = vector.extract %92[0, 0, 0] : f32 from vector<1x1x1xf32>
    %94 = arith.addf %89, %93 : f32
    %cst_36 = arith.constant 2.44140625E-4 : f32
    %95 = arith.mulf %94, %cst_36 : f32
    %96 = vector.broadcast %95 : f32 to vector<1x1xf32>
    %c0_37 = arith.constant 0 : index
    %c0_38 = arith.constant 0 : index
    %97 = vector.load %arg15[%c0_37, %c0_38] : memref<1x1xf32, #tpu.memory_space<vmem>>, vector<1x1xf32>
    tpu.vector_store %arg15[%c0_37, %c0_38], %96 {strides = array<i32>} : memref<1x1xf32, #tpu.memory_space<vmem>>, vector<1x1xf32>,
    %c0_i32_39 = arith.constant 0 : i32
    %98 = tpu.memref_slice %arg18[%c0_i32_39] : memref<2x!tpu.dma_semaphore, #tpu.memory_space<semaphore_mem>> -> memref<1x!tpu.dma_semaphore, #tpu.memory_space<semaphore_mem>>
    %99 = tpu.memref_squeeze %98 : memref<1x!tpu.dma_semaphore, #tpu.memory_space<semaphore_mem>> -> memref<!tpu.dma_semaphore, #tpu.memory_space<semaphore_mem>>
    tpu.wait_dma2 semaphore(%99 : memref<!tpu.dma_semaphore, #tpu.memory_space<semaphore_mem>>) src(%arg9 : memref<128x256xf32, #tpu.memory_space<any>>) dst(%arg16 : memref<128x256xf32, #tpu.memory_space<vmem>>)
    %c1_i32_40 = arith.constant 1 : i32
    %100 = tpu.memref_slice %arg18[%c1_i32_40] : memref<2x!tpu.dma_semaphore, #tpu.memory_space<semaphore_mem>> -> memref<1x!tpu.dma_semaphore, #tpu.memory_space<semaphore_mem>>
    %101 = tpu.memref_squeeze %100 : memref<1x!tpu.dma_semaphore, #tpu.memory_space<semaphore_mem>> -> memref<!tpu.dma_semaphore, #tpu.memory_space<semaphore_mem>>
    tpu.wait_dma2 semaphore(%101 : memref<!tpu.dma_semaphore, #tpu.memory_space<semaphore_mem>>) src(%arg10 : memref<256x64xbf16, #tpu.memory_space<any>>) dst(%arg17 : memref<256x64xbf16, #tpu.memory_space<vmem>>)
    %c0_41 = arith.constant 0 : index
    %c0_42 = arith.constant 0 : index
    %102 = vector.load %arg16[%c0_41, %c0_42] : memref<128x256xf32, #tpu.memory_space<vmem>>, vector<128x256xf32>
    %cst_43 = arith.constant dense<0.000000e+00> : vector<16x256xf32>
    %103 = tpu.matmul %84, %102, %cst_43 {dimension_numbers = #tpu.dot_dimension_numbers<[1], [0], [0], [1], [0, 0, 1, 1], [], []>} : vector<16x128xf32>, vector<128x256xf32>, vector<16x256xf32> -> vector<16x256xf32>
    %cst_44 = arith.constant 0.000000e+00 : f32
    %104 = vector.broadcast %cst_44 : f32 to vector<16x256xf32>
    %105 = arith.maximumf %103, %104 : vector<16x256xf32>
    %c0_45 = arith.constant 0 : index
    %c0_46 = arith.constant 0 : index
    %106 = vector.load %arg17[%c0_45, %c0_46] : memref<256x64xbf16, #tpu.memory_space<vmem>>, vector<256x64xbf16>
    %107 = arith.extf %106 : vector<256x64xbf16> to vector<256x64xf32>
    %cst_47 = arith.constant dense<0.000000e+00> : vector<16x64xf32>
    %108 = tpu.matmul %105, %107, %cst_47 {dimension_numbers = #tpu.dot_dimension_numbers<[1], [0], [0], [1], [0, 0, 1, 1], [], []>} : vector<16x256xf32>, vector<256x64xf32>, vector<16x64xf32> -> vector<16x64xf32>
    %c0_48 = arith.constant 0 : index
    %c0_49 = arith.constant 0 : index
    %109 = vector.load %arg11[%c0_48, %c0_49] : memref<1x64xf32, #tpu.memory_space<vmem>>, vector<1x64xf32>
    %110 = vector.broadcast %109 : vector<1x64xf32> to vector<16x64xf32>
    %111 = arith.addf %108, %110 : vector<16x64xf32>
    %cst_50 = arith.constant 0.000000e+00 : f32
    %112 = vector.broadcast %cst_50 : f32 to vector<16x64xf32>
    %113 = arith.maximumf %111, %112 : vector<16x64xf32>
    %c0_51 = arith.constant 0 : index
    %c0_52 = arith.constant 0 : index
    %114 = vector.load %arg12[%c0_51, %c0_52] : memref<8x64xf32, #tpu.memory_space<vmem>>, vector<8x64xf32>
    %c0_53 = arith.constant 0 : index
    %c0_54 = arith.constant 0 : index
    %115 = vector.load %arg13[%c0_53, %c0_54] : memref<8x64xf32, #tpu.memory_space<vmem>>, vector<8x64xf32>
    %116 = vector.extract_strided_slice %113 {offsets = [0, 0], sizes = [8, 64], strides = [1, 1]} : vector<16x64xf32> to vector<8x64xf32>
    %117 = vector.shape_cast %116 : vector<8x64xf32> to vector<1x8x64xf32>
    %cst_55 = arith.constant dense<0.000000e+00> : vector<1xf32>
    %118 = vector.multi_reduction <add>, %117, %cst_55 [1, 2] : vector<1x8x64xf32> to vector<1xf32>
    %119 = vector.shape_cast %118 : vector<1xf32> to vector<1x1x1xf32>
    %120 = vector.extract %119[0, 0, 0] : f32 from vector<1x1x1xf32>
    %cst_56 = arith.constant 5.120000e+02 : f32
    %121 = arith.divf %120, %cst_56 : f32
    %122 = vector.broadcast %121 : f32 to vector<8x64xf32>
    %123 = arith.subf %116, %122 : vector<8x64xf32>
    %124 = arith.mulf %123, %123 : vector<8x64xf32>
    %125 = vector.shape_cast %124 : vector<8x64xf32> to vector<1x8x64xf32>
    %cst_57 = arith.constant dense<0.000000e+00> : vector<1xf32>
    %126 = vector.multi_reduction <add>, %125, %cst_57 [1, 2] : vector<1x8x64xf32> to vector<1xf32>
    %127 = vector.shape_cast %126 : vector<1xf32> to vector<1x1x1xf32>
    %128 = vector.extract %127[0, 0, 0] : f32 from vector<1x1x1xf32>
    %cst_58 = arith.constant 5.120000e+02 : f32
    %129 = arith.divf %128, %cst_58 : f32
    %cst_59 = arith.constant 9.99999974E-6 : f32
    %130 = arith.addf %129, %cst_59 : f32
    %131 = math.rsqrt %130 : f32
    %132 = vector.broadcast %131 : f32 to vector<8x64xf32>
    %133 = arith.mulf %123, %132 : vector<8x64xf32>
    %134 = arith.mulf %133, %114 : vector<8x64xf32>
    %135 = arith.addf %134, %115 : vector<8x64xf32>
    %c0_60 = arith.constant 0 : index
    %c0_61 = arith.constant 0 : index
    %136 = vector.load %arg14[%c0_60, %c0_61] : memref<16x64xf32, #tpu.memory_space<vmem>>, vector<8x64xf32>
    tpu.vector_store %arg14[%c0_60, %c0_61], %135 {strides = array<i32>} : memref<16x64xf32, #tpu.memory_space<vmem>>, vector<8x64xf32>,
    %137 = vector.extract_strided_slice %113 {offsets = [8, 0], sizes = [8, 64], strides = [1, 1]} : vector<16x64xf32> to vector<8x64xf32>
    %138 = vector.shape_cast %137 : vector<8x64xf32> to vector<1x8x64xf32>
    %cst_62 = arith.constant dense<0.000000e+00> : vector<1xf32>
    %139 = vector.multi_reduction <add>, %138, %cst_62 [1, 2] : vector<1x8x64xf32> to vector<1xf32>
    %140 = vector.shape_cast %139 : vector<1xf32> to vector<1x1x1xf32>
    %141 = vector.extract %140[0, 0, 0] : f32 from vector<1x1x1xf32>
    %cst_63 = arith.constant 5.120000e+02 : f32
    %142 = arith.divf %141, %cst_63 : f32
    %143 = vector.broadcast %142 : f32 to vector<8x64xf32>
    %144 = arith.subf %137, %143 : vector<8x64xf32>
    %145 = arith.mulf %144, %144 : vector<8x64xf32>
    %146 = vector.shape_cast %145 : vector<8x64xf32> to vector<1x8x64xf32>
    %cst_64 = arith.constant dense<0.000000e+00> : vector<1xf32>
    %147 = vector.multi_reduction <add>, %146, %cst_64 [1, 2] : vector<1x8x64xf32> to vector<1xf32>
    %148 = vector.shape_cast %147 : vector<1xf32> to vector<1x1x1xf32>
    %149 = vector.extract %148[0, 0, 0] : f32 from vector<1x1x1xf32>
    %cst_65 = arith.constant 5.120000e+02 : f32
    %150 = arith.divf %149, %cst_65 : f32
    %cst_66 = arith.constant 9.99999974E-6 : f32
    %151 = arith.addf %150, %cst_66 : f32
    %152 = math.rsqrt %151 : f32
    %153 = vector.broadcast %152 : f32 to vector<8x64xf32>
    %154 = arith.mulf %144, %153 : vector<8x64xf32>
    %155 = arith.mulf %154, %114 : vector<8x64xf32>
    %156 = arith.addf %155, %115 : vector<8x64xf32>
    %c8 = arith.constant 8 : index
    %c0_67 = arith.constant 0 : index
    %157 = vector.load %arg14[%c8, %c0_67] : memref<16x64xf32, #tpu.memory_space<vmem>>, vector<8x64xf32>
    tpu.vector_store %arg14[%c8, %c0_67], %156 {strides = array<i32>} : memref<16x64xf32, #tpu.memory_space<vmem>>, vector<8x64xf32>,
    return
  }
}

</mosaic_0001>

<bundles_post_ra>
// kernel: tpu_custom_call.1
= control target key start
LH: loop header
LB: loop body
LE: loop exit
PB: predicated region body
PF: predicated region fallthrough
CT: control target
= control target key end

     0   :  { %21 = vsyncpa [#allocation6], 0  ;;  %s2236_s0 = inlined_call_operand.hbm [shape: f32[16,64], index: 0, kind: input, shape index: {}]   ;;  %s2237_s1 = inlined_call_operand.vmem [shape: bf16[64,256], index: 1, kind: input, shape index: {}]   ;;  %s2238_s2 = inlined_call_operand.hbm [shape: f32[1,256], index: 2, kind: input, shape index: {}]   ;;  %s2239_s3 = inlined_call_operand.hbm [shape: bf16[256,256], index: 3, kind: input, shape index: {}]   ;;  %s2240_s4 = inlined_call_operand.hbm [shape: f32[1,256], index: 4, kind: input, shape index: {}]   ;;  %s2241_s5 = inlined_call_operand.hbm [shape: f32[8,256], index: 5, kind: input, shape index: {}]   ;;  %s2242_s6 = inlined_call_operand.hbm [shape: f32[8,256], index: 6, kind: input, shape index: {}]   ;;  %s2243_s7 = inlined_call_operand.vmem [shape: bf16[256,128], index: 7, kind: input, shape index: {}]   ;;  %s2244_s8 = inlined_call_operand.hbm [shape: f32[1,128], index: 8, kind: input, shape index: {}]   ;;  %s2245_s9 = inlined_call_operand.hbm [shape: f32[128,256], index: 9, kind: input, shape index: {}]   ;;  %s2246_s10 = inlined_call_operand.vmem [shape: bf16[256,64], index: 10, kind: input, shape index: {}]   ;;  %s2247_s11 = inlined_call_operand.hbm [shape: f32[1,64], index: 11, kind: input, shape index: {}]   ;;  %s2248_s12 = inlined_call_operand.vmem [shape: f32[8,64], index: 12, kind: input, shape index: {}]   ;;  %s2249_s13 = inlined_call_operand.hbm [shape: f32[8,64], index: 13, kind: input, shape index: {}]   ;;  %s2250_s14 = inlined_call_operand.hbm [shape: f32[16,64], index: 14, kind: output, shape index: {0}]   ;;  %s2251_s15 = inlined_call_operand.hbm [shape: f32[1,1], index: 15, kind: output, shape index: {1}]  }
   0x1   :  { %22 = vsyncpa [#allocation9], 0 }
   0x2   :  { %23 = vsyncpa [#allocation12], 0 }
   0x3   :  { %24 = vsyncpa [#allocation15], 0 }
   0x4   :  { %25 = vsyncpa [#allocation18], 0 }
   0x5   :  { %26 = vsyncpa [#allocation7], 0  ;;  %s48_s20 = sshll.u32 %s2238_s2, 4  ;;  %s49_s20 = int_to_ptr.hbm [resolvable:$true] %s48_s20 }
   0x6   :  { %27 = vsyncpa [#allocation22], 0  ;;  %s1769_s21 = smov [#allocation8]   ;;  %s72_s25 = sshll.u32 %s2240_s4, 4  ;;  %s73_s25 = int_to_ptr.hbm [resolvable:$true] %s72_s25 }
   0x7   :  { %s50_s22 = sshll.u32 %s1769_s21, 4  ;;  %s1770_s26 = smov [#allocation11]   ;;  %s51_s22 = int_to_ptr.vmem [resolvable:$true] %s50_s22 }
   0x8   :  { %53 = dma.hbm_to_vmem [thread:$0]  %s49_s20, 32, %s51_s22, [#allocation9]  }
   0x9   :  { %s74_s27 = sshll.u32 %s1770_s26, 4  ;;  %s94_s30 = sshll.u32 %s2242_s6, 4  ;;  %s75_s27 = int_to_ptr.vmem [resolvable:$true] %s74_s27  ;;  %s95_s30 = int_to_ptr.hbm [resolvable:$true] %s94_s30 }
   0xa   :  { %77 = dma.hbm_to_vmem [thread:$0]  %s73_s25, 32, %s75_s27, [#allocation12]  }
   0xb   :  { %s118_s17 = sshll.u32 %s2247_s11, 4  ;;  %s1771_s18 = smov [#allocation14]   ;;  %s119_s17 = int_to_ptr.hbm [resolvable:$true] %s118_s17 }
   0xc   :  { %s96_s19 = sshll.u32 %s1771_s18, 4  ;;  %s1772_s4 = smov [#allocation17]   ;;  %s97_s19 = int_to_ptr.vmem [resolvable:$true] %s96_s19 }
   0xd   :  { %99 = dma.hbm_to_vmem [thread:$0]  %s95_s30, 256, %s97_s19, [#allocation15]  }
   0xe   :  { %s120_s20 = sshll.u32 %s1772_s4, 4  ;;  %s32_s23 = sshll.u32 %s2236_s0, 4  ;;  %s121_s20 = int_to_ptr.vmem [resolvable:$true] %s120_s20  ;;  %s33_s23 = int_to_ptr.hbm [resolvable:$true] %s32_s23 }
   0xf   :  { %123 = dma.hbm_to_vmem [thread:$0]  %s119_s17, 16, %s121_s20, [#allocation18]  }
  0x10   :  { %s1773_s6 = smov [#allocation5]   ;;  %s58_s11 = sshll.u32 %s2239_s3, 4  ;;  %s59_s11 = int_to_ptr.hbm [resolvable:$true] %s58_s11 }
  0x11   :  { %s34_s24 = sshll.u32 %s1773_s6, 4  ;;  %s1774_s27 = smov 128   ;;  %s35_s24 = int_to_ptr.vmem [resolvable:$true] %s34_s24 }
  0x12   :  { %s1775_s28 = smov 8   ;;  %s1776_s29 = smov [#allocation10]  }
  0x13   :  { %40 = dma.hbm_to_vmem [thread:$0]  %s33_s23, 256, %s35_s24, [#allocation6], %s1774_s27, %s1774_s27, %s1775_s28  }
  0x14   :  { %s60_s30 = sshll.u32 %s1776_s29, 4  ;;  %s83_s16 = sshll.u32 %s2241_s5, 4  ;;  %s61_s30 = int_to_ptr.vmem [resolvable:$true] %s60_s30  ;;  %s84_s16 = int_to_ptr.hbm [resolvable:$true] %s83_s16 }
  0x15   :  { %66 = dma.hbm_to_vmem [thread:$0]  %s59_s11, 4096, %s61_s30, [#allocation9], %s1774_s27, %s1774_s27, %s1775_s28  }
  0x16   :  { %s107_s18 = sshll.u32 %s2244_s8, 4  ;;  %s1777_s19 = smov [#allocation13]   ;;  %s108_s18 = int_to_ptr.hbm [resolvable:$true] %s107_s18 }
  0x17   :  { %s85_s4 = sshll.u32 %s1777_s19, 4  ;;  %s1778_s20 = smov [#allocation16]   ;;  %s86_s4 = int_to_ptr.vmem [resolvable:$true] %s85_s4 }
  0x18   :  { %88 = dma.hbm_to_vmem [thread:$0]  %s84_s16, 256, %s86_s4, [#allocation12]  }
  0x19   :  { %s109_s21 = sshll.u32 %s1778_s20, 4  ;;  %s131_s5 = sshll.u32 %s2249_s13, 4  ;;  %s110_s21 = int_to_ptr.vmem [resolvable:$true] %s109_s21  ;;  %s132_s5 = int_to_ptr.hbm [resolvable:$true] %s131_s5 }
  0x1a   :  { %112 = dma.hbm_to_vmem [thread:$0]  %s108_s18, 16, %s110_s21, [#allocation15]  }
  0x1b   :  { %s1779_s6 = smov [#allocation19]  }
  0x1c   :  { %s133_s24 = sshll.u32 %s1779_s6, 4  ;;  %s134_s24 = int_to_ptr.vmem [resolvable:$true] %s133_s24 }
  0x1d   :  { %136 = dma.hbm_to_vmem [thread:$0]  %s132_s5, 128, %s134_s24, [#allocation18]  }
  0x1e   :  { %1751 = dma.done.wait [#allocation6], 256  }
  0x1f   :  { %1752 = vsyncadd [#allocation6], 4294967040 }
  0x20   :  { %1753 = dma.done.wait [#allocation9], 4128  }
  0x21   :  { %1754 = vsyncadd [#allocation9], 4294963168 }
  0x22   :  { %1755 = dma.done.wait [#allocation12], 288  }
  0x23   :  { %1756 = vsyncadd [#allocation12], 4294967008 }
  0x24   :  { %1757 = dma.done.wait [#allocation15], 272  }
  0x25   :  { %1758 = vsyncadd [#allocation15], 4294967024 }
  0x26   :  { %1759 = dma.done.wait [#allocation18], 144  }
  0x27   :  { %1760 = vsyncadd [#allocation18], 4294967152  ;;  %s180_s13 = sshll.u32 %s2245_s9, 4  ;;  %s1780_s26 = smov [#allocation2]   ;;  %v1905_v0 = vld [vmem:[%s2246_s10] sm:$0xff]  ;;  %v1910_v1 = vld [vmem:[%s2246_s10 + $0x8] sm:$0xff]  ;;  %s181_s13 = int_to_ptr.hbm [resolvable:$true] %s180_s13 }
  0x28   :  { %s182_s11 = sshll.u32 %s1780_s26, 4  ;;  %v1915_v2 = vld [vmem:[%s2246_s10 + $0x10] sm:$0xff]  ;;  %v1920_v3 = vld [vmem:[%s2246_s10 + $0x18] sm:$0xff]  ;;  %v1925_v4 = vld [vmem:[%s2246_s10 + $0x20] sm:$0xff]  ;;  %s183_s11 = int_to_ptr.vmem [resolvable:$true] %s182_s11 }
  0x29   :  { %185 = dma.hbm_to_vmem [thread:$0]  %s181_s13, 4096, %s183_s11, [#allocation4]  ;;  %v1930_v5 = vld [vmem:[%s2246_s10 + $0x28] sm:$0xff]  ;;  %v1935_v6 = vld [vmem:[%s2246_s10 + $0x30] sm:$0xff]  ;;  %v1940_v7 = vld [vmem:[%s2246_s10 + $0x38] sm:$0xff] }
  0x2a   :  { %v1945_v8 = vld [vmem:[%s2246_s10 + $0x40] sm:$0xff]  ;;  %v1950_v9 = vld [vmem:[%s2246_s10 + $0x48] sm:$0xff]  ;;  %v1955_v10 = vld [vmem:[%s2246_s10 + $0x50] sm:$0xff] }
  0x2b   :  { %v1960_v11 = vld [vmem:[%s2246_s10 + $0x58] sm:$0xff]  ;;  %v1965_v12 = vld [vmem:[%s2246_s10 + $0x60] sm:$0xff]  ;;  %v1970_v13 = vld [vmem:[%s2246_s10 + $0x68] sm:$0xff] }
  0x2c   :  { %v1975_v14 = vld [vmem:[%s2246_s10 + $0x70] sm:$0xff]  ;;  %v1980_v15 = vld [vmem:[%s2246_s10 + $0x78] sm:$0xff] }
  0x2d   :  { %234 = vsyncadd [#allocation4 + $0x1], 2048  ;;  %v244_v16 = vld [vmem:[%s2237_s1 + $0x38] sm:$0xff]  ;;  %v243_v17 = vld [vmem:[%s2237_s1 + $0x30] sm:$0xff]  ;;  %vm267_vm0 = vcmask 523264   ;;  %vm830_vm9 = vcmask 7168  }
  0x2e   :  { %v259_v18 = vunpack.c.l.bf16 %v244_v16  ;;  %v257_v19 = vunpack.c.l.bf16 %v243_v17  ;;  %v260_v20 = vunpack.c.h.bf16 %v244_v16  ;;  %v242_v21 = vld [vmem:[%s2237_s1 + $0x28] sm:$0xff]  ;;  %v258_v22 = vunpack.c.h.bf16 %v243_v17  ;;  %v241_v23 = vld [vmem:[%s2237_s1 + $0x20] sm:$0xff]  ;;  %v240_v28 = vld [vmem:[%s2237_s1 + $0x18] sm:$0xff] }
  0x2f   :  { %v255_v24 = vunpack.c.l.bf16 %v242_v21  ;;  %v256_v25 = vunpack.c.h.bf16 %v242_v21  ;;  %v1994_v26 = vld [vmem:[#allocation10 + $0x78] sm:$0xff]  ;;  %v1996_v27 = vld [vmem:[#allocation10 + $0x70] sm:$0xff]  ;;  %v253_v31 = vunpack.c.l.bf16 %v241_v23  ;;  %v254_v32 = vunpack.c.h.bf16 %v241_v23  ;;  %v2007_v35 = vld [vmem:[#allocation10 + $0x68] sm:$0xff] }
  0x30   :  { %282 = vmatpush.msra.mxu0 %v259_v18  ;;  %305 = vmatpush.msra.mxu1 %v260_v20  ;;  %v2001_v29 = vld [vmem:[#allocation10 + $0xf8] sm:$0xff]  ;;  %v2003_v30 = vld [vmem:[#allocation10 + $0xf0] sm:$0xff]  ;;  %v386_v33 = vunpack.c.l.bf16 %v1994_v26  ;;  %v2009_v36 = vld [vmem:[#allocation10 + $0xe8] sm:$0xff]  ;;  %v384_v38 = vunpack.c.l.bf16 %v1996_v27  ;;  %v251_v40 = vunpack.c.l.bf16 %v240_v28  ;;  %v252_v41 = vunpack.c.h.bf16 %v240_v28 }
  0x31   :  { %v418_v34 = vunpack.c.l.bf16 %v2001_v29  ;;  %v239_v37 = vld [vmem:[%s2237_s1 + $0x10] sm:$0xff]  ;;  %v416_v39 = vunpack.c.l.bf16 %v2003_v30  ;;  %v238_v44 = vld [vmem:[%s2237_s1 + $0x8] sm:$0xff]  ;;  %v382_v45 = vunpack.c.l.bf16 %v2007_v35  ;;  %v414_v46 = vunpack.c.l.bf16 %v2009_v36  ;;  %v237_v51 = vld [vmem:[%s2237_s1] sm:$0xff] }
  0x32   :  { %283 = vmatpush.msra.mxu0 %v257_v19  ;;  %306 = vmatpush.msra.mxu1 %v258_v22  ;;  %v2016_v42 = vld [vmem:[#allocation10 + $0x60] sm:$0xff]  ;;  %v249_v47 = vunpack.c.l.bf16 %v239_v37  ;;  %v250_v48 = vunpack.c.h.bf16 %v239_v37  ;;  %v2025_v49 = vld [vmem:[#allocation10 + $0x58] sm:$0xff]  ;;  %v247_v54 = vunpack.c.l.bf16 %v238_v44  ;;  %v248_v55 = vunpack.c.h.bf16 %v238_v44  ;;  %v2036_v60 = vld [vmem:[#allocation10 + $0x50] sm:$0xff] }
  0x33   :  { %v2018_v43 = vld [vmem:[#allocation10 + $0xe0] sm:$0xff]  ;;  %426 = vmatpush.msra.mxu2 %v386_v33  ;;  %449 = vmatpush.msra.mxu3 %v418_v34  ;;  %v2027_v50 = vld [vmem:[#allocation10 + $0xd8] sm:$0xff]  ;;  %v380_v52 = vunpack.c.l.bf16 %v2016_v42  ;;  %v378_v56 = vunpack.c.l.bf16 %v2025_v49  ;;  %v245_v58 = vunpack.c.l.bf16 %v237_v51  ;;  %v246_v59 = vunpack.c.h.bf16 %v237_v51  ;;  %v2038_v61 = vld [vmem:[#allocation10 + $0xd0] sm:$0xff] }
  0x34   :  { %284 = vmatpush.msra.mxu0 %v255_v24  ;;  %307 = vmatpush.msra.mxu1 %v256_v25  ;;  %v412_v53 = vunpack.c.l.bf16 %v2018_v43  ;;  %v410_v57 = vunpack.c.l.bf16 %v2027_v50  ;;  %v235_v62 = vld [vmem:[#allocation5] sm:$0xff]  ;;  %v387_v63 = vunpack.c.h.bf16 %v1994_v26  ;;  %v419_v16 = vunpack.c.h.bf16 %v2001_v29  ;;  %v2050_v23 = vld [vmem:[#allocation10 + $0x40] sm:$0xff]  ;;  %v2060_v29 = vld [vmem:[#allocation10 + $0x38] sm:$0xff] }
  0x35   :  { %427 = vmatpush.msra.mxu2 %v384_v38  ;;  %450 = vmatpush.msra.mxu3 %v416_v39  ;;  %v2042_v17 = vld [vmem:[#allocation10 + $0x48] sm:$0xff]  ;;  %v376_v19 = vunpack.c.l.bf16 %v2036_v60  ;;  %v408_v20 = vunpack.c.l.bf16 %v2038_v61  ;;  %v385_v21 = vunpack.c.h.bf16 %v1996_v27  ;;  %v417_v22 = vunpack.c.h.bf16 %v2003_v30  ;;  %v2052_v24 = vld [vmem:[#allocation10 + $0xc0] sm:$0xff]  ;;  %v330_v34 = vld [vmem:[#allocation10 + $0x30] sm:$0xff] }
  0x36   :  { %285 = vmatpush.msra.mxu0 %v253_v31  ;;  %308 = vmatpush.msra.mxu1 %v254_v32  ;;  %v2044_v18 = vld [vmem:[#allocation10 + $0xc8] sm:$0xff]  ;;  %v374_v25 = vunpack.c.l.bf16 %v2042_v17  ;;  %v383_v28 = vunpack.c.h.bf16 %v2007_v35  ;;  %v415_v27 = vunpack.c.h.bf16 %v2009_v36  ;;  %v372_v30 = vunpack.c.l.bf16 %v2050_v23  ;;  %v347_v37 = vld [vmem:[#allocation10 + $0xb8] sm:$0xff] }
  0x37   :  { %428 = vmatpush.msra.mxu2 %v382_v45  ;;  %451 = vmatpush.msra.mxu3 %v414_v46  ;;  %v406_v26 = vunpack.c.l.bf16 %v2044_v18  ;;  %v404_v31 = vunpack.c.l.bf16 %v2052_v24  ;;  %v381_v32 = vunpack.c.h.bf16 %v2016_v42  ;;  %v413_v33 = vunpack.c.h.bf16 %v2018_v43  ;;  %v236_v39 = vld [vmem:[#allocation5 + $0x8] sm:$0xff]  ;;  %v328_v46 = vld [vmem:[#allocation10 + $0x20] sm:$0xff] }
  0x38   :  { %286 = vmatpush.msra.mxu0 %v251_v40  ;;  %309 = vmatpush.msra.mxu1 %v252_v41  ;;  %v370_v35 = vunpack.c.l.bf16 %v2060_v29  ;;  %v379_v36 = vunpack.c.h.bf16 %v2025_v49  ;;  %v411_v38 = vunpack.c.h.bf16 %v2027_v50  ;;  %v329_v40 = vld [vmem:[#allocation10 + $0x28] sm:$0xff]  ;;  %v368_v41 = vunpack.c.l.bf16 %v330_v34  ;;  %v346_v45 = vld [vmem:[#allocation10 + $0xb0] sm:$0xff]  ;;  %v327_v51 = vld [vmem:[#allocation10 + $0x18] sm:$0xff] }
  0x39   :  { %429 = vmatpush.msra.mxu2 %v380_v52  ;;  %452 = vmatpush.msra.mxu3 %v412_v53  ;;  %v402_v42 = vunpack.c.l.bf16 %v347_v37  ;;  %v377_v43 = vunpack.c.h.bf16 %v2036_v60  ;;  %v409_v44 = vunpack.c.h.bf16 %v2038_v61  ;;  %v407_v49 = vunpack.c.h.bf16 %v2044_v18  ;;  %v345_v50 = vld [vmem:[#allocation10 + $0xa8] sm:$0xff] }
  0x3a   :  { %287 = vmatpush.msra.mxu0 %v249_v47  ;;  %310 = vmatpush.msra.mxu1 %v250_v48  ;;  %v366_v47 = vunpack.c.l.bf16 %v329_v40  ;;  %v375_v48 = vunpack.c.h.bf16 %v2042_v17  ;;  %v400_v52 = vunpack.c.l.bf16 %v346_v45  ;;  %v364_v53 = vunpack.c.l.bf16 %v328_v46 }
  0x3b   :  { %430 = vmatpush.msra.mxu2 %v378_v56  ;;  %453 = vmatpush.msra.mxu3 %v410_v57  ;;  %v344_v56 = vld [vmem:[#allocation10 + $0xa0] sm:$0xff]  ;;  %v398_v57 = vunpack.c.l.bf16 %v345_v50  ;;  %v403_v60 = vunpack.c.h.bf16 %v347_v37  ;;  %v399_v17 = vunpack.c.h.bf16 %v345_v50  ;;  %v365_v18 = vunpack.c.h.bf16 %v328_v46 }
  0x3c   :  { %288 = vmatpush.msra.mxu0 %v247_v54  ;;  %311 = vmatpush.msra.mxu1 %v248_v55  ;;  %v373_v54 = vunpack.c.h.bf16 %v2050_v23  ;;  %v405_v55 = vunpack.c.h.bf16 %v2052_v24  ;;  %v396_v61 = vunpack.c.l.bf16 %v344_v56  ;;  %vm846_vm14 = vcmask 0  }
  0x3d   :  { %431 = vmatpush.msra.mxu2 %v376_v19  ;;  %454 = vmatpush.msra.mxu3 %v408_v20  ;;  %v397_v19 = vunpack.c.h.bf16 %v344_v56  ;;  %v363_v20 = vunpack.c.h.bf16 %v327_v51 }
  0x3e   :  { %289 = vmatpush.msra.mxu0 %v245_v58  ;;  %312 = vmatpush.msra.mxu1 %v246_v59  ;;  %v362_v58 = vunpack.c.l.bf16 %v327_v51  ;;  %v371_v59 = vunpack.c.h.bf16 %v2060_v29 }
  0x3f   :  { %1230 = vmatmul.msk.f32.vlgmr.msra.gmra.mxu0 %vm267_vm0, %v235_v62  ;;  %1232 = vmatmul.msk.f32.vlgmr.msra.gmra.mxu1 %vm267_vm0, %v235_v62  ;;  %v369_v62 = vunpack.c.h.bf16 %v330_v34  ;;  %v341_v34 = vld [vmem:[#allocation10 + $0x88] sm:$0xff] }
  0x40   :  { %472 = vmatpush.msrb.mxu0 %v387_v63  ;;  %495 = vmatpush.msrb.mxu1 %v419_v16  ;;  %v401_v63 = vunpack.c.h.bf16 %v346_v45  ;;  %v367_v16 = vunpack.c.h.bf16 %v329_v40 }
  0x41   :  { %432 = vmatpush.msra.mxu2 %v374_v25  ;;  %455 = vmatpush.msra.mxu3 %v406_v26 }
  0x42   :  { %473 = vmatpush.msrb.mxu0 %v385_v21  ;;  %496 = vmatpush.msrb.mxu1 %v417_v22  ;;  %v326_v21 = vld [vmem:[#allocation10 + $0x10] sm:$0xff]  ;;  %v343_v22 = vld [vmem:[#allocation10 + $0x98] sm:$0xff] }
  0x43   :  { %433 = vmatpush.msra.mxu2 %v372_v30  ;;  %456 = vmatpush.msra.mxu3 %v404_v31  ;;  %v360_v23 = vunpack.c.l.bf16 %v326_v21  ;;  %v394_v24 = vunpack.c.l.bf16 %v343_v22  ;;  %v361_v25 = vunpack.c.h.bf16 %v326_v21  ;;  %v395_v26 = vunpack.c.h.bf16 %v343_v22 }
  0x44   :  { %474 = vmatpush.msrb.mxu0 %v383_v28  ;;  %497 = vmatpush.msrb.mxu1 %v415_v27  ;;  %v325_v28 = vld [vmem:[#allocation10 + $0x8] sm:$0xff]  ;;  %v342_v27 = vld [vmem:[#allocation10 + $0x90] sm:$0xff] }
  0x45   :  { %434 = vmatpush.msra.mxu2 %v370_v35  ;;  %457 = vmatpush.msra.mxu3 %v402_v42  ;;  %v358_v29 = vunpack.c.l.bf16 %v325_v28  ;;  %v392_v30 = vunpack.c.l.bf16 %v342_v27  ;;  %v359_v31 = vunpack.c.h.bf16 %v325_v28  ;;  %v390_v35 = vunpack.c.l.bf16 %v341_v34  ;;  %v261_v42 = vld [vmem:[#allocation8] sm:$0x3] }
  0x46   :  { %475 = vmatpush.msrb.mxu0 %v381_v32  ;;  %498 = vmatpush.msrb.mxu1 %v413_v33  ;;  %v393_v32 = vunpack.c.h.bf16 %v342_v27  ;;  %v324_v33 = vld [vmem:[#allocation10] sm:$0xff] }
  0x47   :  { %1231 = vmatmul.msk.f32.gmra.mxu0 %vm267_vm0, %v236_v39  ;;  %435 = vmatpush.msra.mxu2 %v368_v41  ;;  %v356_v37 = vunpack.c.l.bf16 %v324_v33 }
  0x48   :  { %476 = vmatpush.msrb.mxu0 %v379_v36  ;;  %499 = vmatpush.msrb.mxu1 %v411_v38  ;;  %v357_v36 = vunpack.c.h.bf16 %v324_v33  ;;  %v391_v38 = vunpack.c.h.bf16 %v341_v34  ;;  %v1781_v34 = vmov 2048.0  }
  0x49   :  { %1233 = vmatmul.msk.f32.gmra.mxu1 %vm267_vm0, %v236_v39  ;;  %436 = vmatpush.msra.mxu2 %v366_v47  ;;  %v340_v39 = vld [vmem:[#allocation10 + $0x80] sm:$0xff]  ;;  %1450 = vrcp.f32 %v1781_v34  ;;  %v1373_v34 = vld [vmem:[%s2243_s7 + $0x20] sm:$0xff]  }
  0x4a   :  { %477 = vmatpush.msrb.mxu0 %v377_v43  ;;  %500 = vmatpush.msrb.mxu1 %v409_v44  ;;  %v388_v40 = vunpack.c.l.bf16 %v340_v39  ;;  %v389_v41 = vunpack.c.h.bf16 %v340_v39  ;;  %v263_v43 = vperm.slane %v261_v42, 0  ;;  %v264_v44 = vperm.slane %v261_v42, 1 }
  0x4b   :  { %458 = vmatpush.msra.mxu3 %v400_v52  ;;  %437 = vmatpush.msra.mxu2 %v364_v53 }
  0x4c   :  { %478 = vmatpush.msrb.mxu0 %v375_v48  ;;  %501 = vmatpush.msrb.mxu1 %v407_v49 }
  0x4d   :  { %459 = vmatpush.msra.mxu3 %v398_v57  ;;  %438 = vmatpush.msra.mxu2 %v362_v58  ;;  %v420_v57 = vld [vmem:[#allocation11] sm:$0x3] }
  0x4e   :  { %479 = vmatpush.msrb.mxu0 %v373_v54  ;;  %502 = vmatpush.msrb.mxu1 %v405_v55  ;;  %v423_v58 = vperm.slane %v420_v57, 1 }
  0x4f   :  { %460 = vmatpush.msra.mxu3 %v396_v61  ;;  %439 = vmatpush.msra.mxu2 %v360_v23  ;;  %v422_v61 = vperm.slane %v420_v57, 0 }
  0x50   :  { %480 = vmatpush.msrb.mxu0 %v371_v59  ;;  %503 = vmatpush.msrb.mxu1 %v403_v60 }
  0x51   :  { %461 = vmatpush.msra.mxu3 %v394_v24  ;;  %440 = vmatpush.msra.mxu2 %v358_v29 }
  0x52   :  { %481 = vmatpush.msrb.mxu0 %v369_v62  ;;  %504 = vmatpush.msrb.mxu1 %v401_v63 }
  0x53   :  { %462 = vmatpush.msra.mxu3 %v392_v30  ;;  %441 = vmatpush.msra.mxu2 %v356_v37  ;;  %v1451_v37 = vpop.eup %1450 }
  0x54   :  { %482 = vmatpush.msrb.mxu0 %v367_v16  ;;  %505 = vmatpush.msrb.mxu1 %v399_v17  ;;  %vm541_vm1 = vweird.f32 %v1451_v37 }
  0x55   :  { %463 = vmatpush.msra.mxu3 %v390_v35  ;;  %v537_v35 = vmul.f32 2048.0, %v1451_v37 }
  0x56   :  { %483 = vmatpush.msrb.mxu0 %v365_v18  ;;  %506 = vmatpush.msrb.mxu1 %v397_v19 }
  0x57   :  { %464 = vmatpush.msra.mxu3 %v388_v40 }
  0x58   :  { %484 = vmatpush.msrb.mxu0 %v363_v20  ;;  %507 = vmatpush.msrb.mxu1 %v395_v26 }
  0x5a   :  { %485 = vmatpush.msrb.mxu0 %v361_v25  ;;  %508 = vmatpush.msrb.mxu1 %v393_v32 }
  0x5c   :  { %486 = vmatpush.msrb.mxu0 %v359_v31  ;;  %509 = vmatpush.msrb.mxu1 %v391_v38 }
  0x5e   :  { %487 = vmatpush.msrb.mxu0 %v357_v36  ;;  %510 = vmatpush.msrb.mxu1 %v389_v41  ;;  %v538_v36 = vsub.f32 1.0, %v537_v35 }
  0x60   :  { %v539_v41 = vmul.f32 %v1451_v37, %v538_v36 }
  0xbc   :  { %v291_v45 = vpop.f32.mrf.mxu0  ;;  %v314_v46 = vpop.f32.mrf.mxu1 }
  0xbd   :  { %v292_v47 = vadd.f32 %v291_v45, %v263_v43  ;;  %v315_v48 = vadd.f32 %v314_v46, %v264_v44 }
  0xbf   :  { %v320_v49 = vmax.f32 %v292_v47, 0.0  ;;  %v321_v50 = vmax.f32 %v315_v48, 0.0 }
  0xc1   :  { %442 = vmatmul.f32.vlgmr.msra.gmra.mxu2 %v320_v49  ;;  %488 = vmatmul.f32.vlgmr.msrb.gmra.mxu0 %v320_v49 }
  0xc2   :  { %465 = vmatmul.f32.vlgmr.msra.gmra.mxu3 %v321_v50  ;;  %511 = vmatmul.f32.vlgmr.msrb.gmra.mxu1 %v321_v50 }
  0xc4   :  { %v294_v51 = vpop.f32.mrf.mxu0 }
  0xc5   :  { %v295_v52 = vadd.f32 %v294_v51, %v263_v43 }
  0xc6   :  { %v317_v54 = vpop.f32.mrf.mxu1 }
  0xc7   :  { %v322_v53 = vmax.f32 %v295_v52, 0.0  ;;  %v318_v55 = vadd.f32 %v317_v54, %v264_v44  ;;  %v540_v44 = vadd.f32 %v1451_v37, %v539_v41 }
  0xc9   :  { %445 = vmatmul.f32.gmra.mxu2 %v322_v53  ;;  %491 = vmatmul.f32.gmra.mxu0 %v322_v53  ;;  %v323_v56 = vmax.f32 %v318_v55, 0.0  ;;  %v542_v47 = vsel %vm541_vm1, %v1451_v37, %v540_v44  ;;  %v1381_v37 = vld [vmem:[%s2243_s7 + $0x60] sm:$0xff]   ;;  %v1260_v44 = vunpack.c.l.bf16 %v1373_v34 }
  0xcb   :  { %468 = vmatmul.f32.gmra.mxu3 %v323_v56  ;;  %514 = vmatmul.f32.gmra.mxu1 %v323_v56 }
 0x13e   :  { %v489_v59 = vpop.f32.mrf.mxu0 }
 0x13f   :  { %v490_v60 = vadd.f32 %v489_v59, %v423_v58  ;;  %v512_v62 = vpop.f32.mrf.mxu1 }
 0x141   :  { %v513_v16 = vadd.f32 %v512_v62, %v490_v60  ;;  %v1384_v62 = vld [vmem:[%s2243_s7 + $0x78] sm:$0xff]  }
 0x143   :  { %v519_v20 = vmax.f32 %v513_v16, 0.0 }
 0x144   :  { %v443_v63 = vpop.f32.mrf.mxu2 }
 0x145   :  { %v444_v17 = vadd.f32 %v443_v63, %v422_v61  ;;  %v466_v18 = vpop.f32.mrf.mxu3  ;;  %v1375_v63 = vld [vmem:[%s2243_s7 + $0x30] sm:$0xff]  }
 0x146   :  { %v492_v24 = vpop.f32.mrf.mxu0 }
 0x147   :  { %v467_v19 = vadd.f32 %v466_v18, %v444_v17  ;;  %v493_v26 = vadd.f32 %v492_v24, %v423_v58  ;;  %v1305_v17 = vunpack.c.h.bf16 %v1384_v62  ;;  %v1382_v24 = vld [vmem:[%s2243_s7 + $0x68] sm:$0xff]  }
 0x148   :  { %v515_v27 = vpop.f32.mrf.mxu1  ;;  %v1296_v36 = vunpack.c.l.bf16 %v1382_v24 }
 0x149   :  { %v518_v21 = vmax.f32 %v467_v19, 0.0  ;;  %v2080_v30 = vadd.f32 %v515_v27, %v493_v26  ;;  %v1304_v19 = vunpack.c.l.bf16 %v1384_v62  ;;  %739 = vmatpush.msrb.mxu3 %v1305_v17 }
 0x14b   :  { %v526_v22 = vadd.f32 %v519_v20, %v518_v21  ;;  %v521_v32 = vmax.f32 %v2080_v30, 0.0  ;;  %740 = vmatpush.msrb.mxu3 %v1304_v19 }
 0x14c   :  { %v446_v23 = vpop.f32.mrf.mxu2 }
 0x14d   :  { %527 = vadd.xlane.f32.xlu0 %v526_v22  ;;  %v447_v25 = vadd.f32 %v446_v23, %v422_v61  ;;  %v1376_v61 = vld [vmem:[%s2243_s7 + $0x38] sm:$0xff]   ;;  %v1374_v23 = vld [vmem:[%s2243_s7 + $0x28] sm:$0xff]  }
 0x14e   :  { %v469_v28 = vpop.f32.mrf.mxu3  ;;  %v1273_v16 = vunpack.c.h.bf16 %v1376_v61  ;;  %v1272_v18 = vunpack.c.l.bf16 %v1376_v61  ;;  %v1265_v27 = vunpack.c.h.bf16 %v1374_v23  ;;  %v1264_v35 = vunpack.c.l.bf16 %v1374_v23  ;;  %v1378_v23 = vld [vmem:[%s2243_s7 + $0x48] sm:$0xff]  }
 0x14f   :  { %v2078_v29 = vadd.f32 %v469_v28, %v447_v25  ;;  %v1268_v25 = vunpack.c.l.bf16 %v1375_v63 }
 0x150   :  { %716 = vmatpush.msrb.mxu2 %v1273_v16 }
 0x151   :  { %v520_v31 = vmax.f32 %v2078_v29, 0.0 }
 0x152   :  { %717 = vmatpush.msrb.mxu2 %v1272_v18 }
 0x153   :  { %v589_v33 = vadd.f32 %v521_v32, %v520_v31 }
 0x155   :  { %590 = vadd.xlane.f32.xlu1 %v589_v33  ;;  %v1297_v33 = vunpack.c.h.bf16 %v1382_v24 }
 0x1c0   :  { %v528_v38 = vpop.xlane.xlu0 %527 }
 0x1c1   :  { %v529_v39 = vrot.slane %v528_v38, 4 }
 0x1c3   :  { %v530_v40 = vadd.f32 %v529_v39, %v528_v38  ;;  %v1261_v39 = vunpack.c.h.bf16 %v1373_v34 }
 0x1c5   :  { %v531_v42 = vrot.slane %v530_v40, 2 }
 0x1c7   :  { %v532_v43 = vadd.f32 %v531_v42, %v530_v40  ;;  %v1293_v40 = vunpack.c.h.bf16 %v1381_v37  ;;  %v1372_v42 = vld [vmem:[%s2243_s7 + $0x18] sm:$0xff]  }
 0x1c8   :  { %v591_v28 = vpop.xlane.xlu1 %590 }
 0x1c9   :  { %v533_v45 = vrot.slane %v532_v43, 1  ;;  %v592_v38 = vrot.slane %v591_v28, 4 }
 0x1cb   :  { %v534_v46 = vadd.f32 %v533_v45, %v532_v43  ;;  %v1380_v43 = vld [vmem:[%s2243_s7 + $0x58] sm:$0xff]   ;;  %v1292_v45 = vunpack.c.l.bf16 %v1381_v37 }
 0x1cd   :  { %1400 = vpush %v534_v46  ;;  %v593_v46 = vadd.f32 %v592_v38, %v591_v28  ;;  %v1280_v28 = vunpack.c.l.bf16 %v1378_v23  ;;  %v522_v38 = vld [vmem:[#allocation13] sm:$0xff] }
 0x1ce   :  { %1402 = vpush %v542_v47  ;;  %v1257_v47 = vunpack.c.h.bf16 %v1372_v42 }
 0x1fe   :  { %s1401_s1 = spop %1400 }
 0x1ff   :  { %s2088_s30 = spop %1402 }
 0x200   :  { %s544_s0 = smul.f32 %s2088_s30, %s1401_s1 }
 0x202   :  { %v545_v48 = vstv %s544_s0 }
 0x203   :  { %v2091_v49 = vsub.f32 %v518_v21, %v545_v48  ;;  %v2093_v50 = vsub.f32 %v519_v20, %v545_v48  ;;  %v1383_v20 = vld [vmem:[%s2243_s7 + $0x70] sm:$0xff]   ;;  %v1269_v21 = vunpack.c.h.bf16 %v1375_v63  ;;  %v1289_v48 = vunpack.c.h.bf16 %v1380_v43 }
 0x204   :  { %v1301_v22 = vunpack.c.h.bf16 %v1383_v20  ;;  %v1300_v26 = vunpack.c.l.bf16 %v1383_v20 }
 0x205   :  { %v548_v51 = vmul.f32 %v2091_v49, %v2091_v49  ;;  %v549_v52 = vmul.f32 %v2093_v50, %v2093_v50  ;;  %718 = vmatpush.msrb.mxu2 %v1269_v21 }
 0x206   :  { %741 = vmatpush.msrb.mxu3 %v1301_v22  ;;  %v1370_v22 = vld [vmem:[%s2243_s7 + $0x8] sm:$0xff]  }
 0x207   :  { %v550_v53 = vadd.f32 %v549_v52, %v548_v51  ;;  %719 = vmatpush.msrb.mxu2 %v1268_v25  ;;  %v1371_v51 = vld [vmem:[%s2243_s7 + $0x10] sm:$0xff]   ;;  %v1249_v24 = vunpack.c.h.bf16 %v1370_v22  ;;  %v1281_v25 = vunpack.c.h.bf16 %v1378_v23 }
 0x208   :  { %742 = vmatpush.msrb.mxu3 %v1300_v26  ;;  %v1379_v52 = vld [vmem:[%s2243_s7 + $0x50] sm:$0xff]   ;;  %v1248_v26 = vunpack.c.l.bf16 %v1370_v22 }
 0x209   :  { %551 = vadd.xlane.f32.xlu0 %v550_v53  ;;  %720 = vmatpush.msrb.mxu2 %v1265_v27  ;;  %v1256_v53 = vunpack.c.l.bf16 %v1372_v42  ;;  %v1284_v61 = vunpack.c.l.bf16 %v1379_v52  ;;  %v1243_v27 = vld [vmem:[%s2243_s7] sm:$0xff]  }
 0x20a   :  { %743 = vmatpush.msrb.mxu3 %v1297_v33  ;;  %v1377_v33 = vld [vmem:[%s2243_s7 + $0x40] sm:$0xff]   ;;  %v1245_v34 = vunpack.c.h.bf16 %v1243_v27 }
 0x20b   :  { %721 = vmatpush.msrb.mxu2 %v1264_v35  ;;  %v1277_v37 = vunpack.c.h.bf16 %v1377_v33  ;;  %v1244_v35 = vunpack.c.l.bf16 %v1243_v27 }
 0x20c   :  { %744 = vmatpush.msrb.mxu3 %v1296_v36  ;;  %v1276_v36 = vunpack.c.l.bf16 %v1377_v33 }
 0x20d   :  { %722 = vmatpush.msrb.mxu2 %v1261_v39  ;;  %v523_v39 = vld [vmem:[#allocation13 + $0x8] sm:$0xff] }
 0x20e   :  { %745 = vmatpush.msrb.mxu3 %v1293_v40 }
 0x20f   :  { %723 = vmatpush.msrb.mxu2 %v1260_v44  ;;  %v525_v44 = vld [vmem:[#allocation14 + $0x8] sm:$0xff] }
 0x210   :  { %746 = vmatpush.msrb.mxu3 %v1292_v45 }
 0x211   :  { %724 = vmatpush.msrb.mxu2 %v1257_v47 }
 0x212   :  { %747 = vmatpush.msrb.mxu3 %v1289_v48 }
 0x213   :  { %725 = vmatpush.msrb.mxu2 %v1256_v53 }
 0x27c   :  { %v552_v54 = vpop.xlane.xlu0 %551 }
 0x27d   :  { %v553_v55 = vrot.slane %v552_v54, 4 }
 0x27f   :  { %v554_v56 = vadd.f32 %v553_v55, %v552_v54  ;;  %v1288_v54 = vunpack.c.l.bf16 %v1380_v43  ;;  %v594_v55 = vrot.slane %v593_v46, 2  ;;  %v524_v43 = vld [vmem:[#allocation14] sm:$0xff] }
 0x281   :  { %v555_v57 = vrot.slane %v554_v56, 2  ;;  %748 = vmatpush.msrb.mxu3 %v1288_v54  ;;  %v595_v63 = vadd.f32 %v594_v55, %v593_v46 }
 0x283   :  { %v556_v58 = vadd.f32 %v555_v57, %v554_v56  ;;  %v1253_v57 = vunpack.c.h.bf16 %v1371_v51  ;;  %v596_v18 = vrot.slane %v595_v63, 1 }
 0x285   :  { %v557_v59 = vrot.slane %v556_v58, 1  ;;  %726 = vmatpush.msrb.mxu2 %v1253_v57  ;;  %v597_v21 = vadd.f32 %v596_v18, %v595_v63 }
 0x287   :  { %v558_v60 = vadd.f32 %v557_v59, %v556_v58  ;;  %v1285_v58 = vunpack.c.h.bf16 %v1379_v52 }
 0x289   :  { %1404 = vpush %v558_v60  ;;  %v1252_v60 = vunpack.c.l.bf16 %v1371_v51  ;;  %749 = vmatpush.msrb.mxu3 %v1285_v58 }
 0x28b   :  { %727 = vmatpush.msrb.mxu2 %v1252_v60  ;;  %750 = vmatpush.msrb.mxu3 %v1284_v61 }
 0x28d   :  { %728 = vmatpush.msrb.mxu2 %v1249_v24  ;;  %751 = vmatpush.msrb.mxu3 %v1281_v25 }
 0x28f   :  { %729 = vmatpush.msrb.mxu2 %v1248_v26  ;;  %752 = vmatpush.msrb.mxu3 %v1280_v28 }
 0x291   :  { %730 = vmatpush.msrb.mxu2 %v1245_v34  ;;  %753 = vmatpush.msrb.mxu3 %v1277_v37 }
 0x293   :  { %731 = vmatpush.msrb.mxu2 %v1244_v35  ;;  %754 = vmatpush.msrb.mxu3 %v1276_v36 }
 0x2ba   :  { %s1405_s5 = spop %1404 }
 0x2bb   :  { %s568_s10 = smul.f32 %s1405_s5, %s2088_s30 }
 0x2bd   :  { %s569_s13 = sadd.f32 1e-05, %s568_s10 }
 0x2bf   :  { %v570_v41 = vstv %s569_s13 }
 0x2c0   :  { %1452 = vrsqrt.f32 %v570_v41  ;;  %vm577_vm3 = vweird.f32 %v570_v41 }
 0x2c6   :  { %v1453_v56 = vpop.eup %1452 }
 0x2c7   :  { %v572_v59 = vmul.f32 %v1453_v56, %v570_v41  ;;  %vm578_vm2 = vweird.f32 %v1453_v56 }
 0x2c8   :  { %vm579_vm4 = vmor %vm577_vm3, %vm578_vm2 }
 0x2c9   :  { %v573_v62 = vmul.f32 %v1453_v56, %v572_v59 }
 0x2cb   :  { %v574_v16 = vmul.f32 0.5, %v573_v62 }
 0x2cd   :  { %v575_v17 = vsub.f32 1.5, %v574_v16  ;;  %v1449_v16 = vld [vmem:[#allocation16] ss:$0 sm:$0xff] }
 0x2cf   :  { %v576_v19 = vmul.f32 %v1453_v56, %v575_v17 }
 0x2d1   :  { %v580_v20 = vsel %vm579_vm4, %v1453_v56, %v576_v19 }
 0x2d2   :  { %1406 = vpush %v580_v20 }
 0x2d3   :  { %1408 = vpush %v597_v21 }
 0x303   :  { %s1407_s23 = spop %1406 }
 0x304   :  { %v582_v40 = vstv %s1407_s23  ;;  %s1409_s5 = spop %1408 }
 0x305   :  { %v583_v41 = vmul.f32 %v582_v40, %v2091_v49  ;;  %v584_v42 = vmul.f32 %v582_v40, %v2093_v50  ;;  %s607_s7 = smul.f32 %s1409_s5, %s2088_s30 }
 0x307   :  { %v585_v45 = vmul.f32 %v583_v41, %v522_v38  ;;  %v586_v46 = vmul.f32 %v584_v42, %v523_v39  ;;  %v608_v47 = vstv %s607_s7 }
 0x308   :  { %v609_v48 = vsub.f32 %v520_v31, %v608_v47  ;;  %v610_v51 = vsub.f32 %v521_v32, %v608_v47 }
 0x309   :  { %v587_v52 = vadd.f32 %v585_v45, %v524_v43  ;;  %v588_v53 = vadd.f32 %v586_v46, %v525_v44 }
 0x30a   :  { %v611_v54 = vmul.f32 %v609_v48, %v609_v48  ;;  %v612_v55 = vmul.f32 %v610_v51, %v610_v51 }
 0x30b   :  { %732 = vmatmul.f32.vlgmr.msrb.gmra.mxu2 %v587_v52  ;;  %v814_v49 = vmul.f32 %v587_v52, %v587_v52  ;;  %755 = vmatmul.f32.vlgmr.msrb.gmra.mxu3 %v588_v53  ;;  %v815_v50 = vmul.f32 %v588_v53, %v588_v53 }
 0x30c   :  { %v613_v56 = vadd.f32 %v612_v55, %v611_v54  ;;  %v770_v55 = vlaneseq }
 0x30d   :  { %v818_v57 = vadd.f32 %v815_v50, %v814_v49 }
 0x30e   :  { %614 = vadd.xlane.f32.xlu1 %v613_v56 }
 0x381   :  { %v615_v58 = vpop.xlane.xlu1 %614 }
 0x382   :  { %v616_v59 = vrot.slane %v615_v58, 4 }
 0x384   :  { %v617_v60 = vadd.f32 %v616_v59, %v615_v58 }
 0x386   :  { %v618_v29 = vrot.slane %v617_v60, 2 }
 0x388   :  { %v619_v31 = vadd.f32 %v618_v29, %v617_v60 }
 0x38a   :  { %v620_v61 = vrot.slane %v619_v31, 1 }
 0x38c   :  { %v621_v30 = vadd.f32 %v620_v61, %v619_v31 }
 0x38e   :  { %1410 = vpush %v621_v30  ;;  %v733_v32 = vpop.f32.mrf.mxu2  ;;  %v756_v62 = vpop.f32.mrf.mxu3 }
 0x38f   :  { %v757_v63 = vadd.f32 %v756_v62, %v733_v32 }
 0x391   :  { %v763_v17 = vmul.f32 2.0, %v757_v63 }
 0x393   :  { %v768_v18 = vsub.f32 %v1449_v16, %v763_v17 }
 0x395   :  { %772 = vmin.xlane.f32.xlu2 %v768_v18 }
 0x3bf   :  { %s1411_s10 = spop %1410 }
 0x3c0   :  { %s631_s6 = smul.f32 %s1411_s10, %s2088_s30 }
 0x3c2   :  { %s632_s24 = sadd.f32 1e-05, %s631_s6 }
 0x3c4   :  { %v633_v19 = vstv %s632_s24 }
 0x3c5   :  { %1454 = vrsqrt.f32 %v633_v19  ;;  %vm640_vm6 = vweird.f32 %v633_v19 }
 0x3cb   :  { %v1455_v20 = vpop.eup %1454 }
 0x3cc   :  { %v635_v21 = vmul.f32 %v1455_v20, %v633_v19  ;;  %vm641_vm5 = vweird.f32 %v1455_v20 }
 0x3cd   :  { %vm642_vm7 = vmor %vm640_vm6, %vm641_vm5 }
 0x3ce   :  { %v636_v22 = vmul.f32 %v1455_v20, %v635_v21 }
 0x3d0   :  { %v637_v23 = vmul.f32 0.5, %v636_v22 }
 0x3d2   :  { %v638_v24 = vsub.f32 1.5, %v637_v23 }
 0x3d4   :  { %v639_v25 = vmul.f32 %v1455_v20, %v638_v24 }
 0x3d6   :  { %v643_v26 = vsel %vm642_vm7, %v1455_v20, %v639_v25 }
 0x3d7   :  { %1412 = vpush %v643_v26 }
 0x408   :  { %s1413_s8 = spop %1412  ;;  %v773_v49 = vpop.xlane.xlu2 %772 }
 0x409   :  { %v645_v28 = vstv %s1413_s8  ;;  %vm776_vm8 = vcmp.eq.f32.partialorder %v768_v18, %v773_v49  ;;  %v831_v29 = vsel %vm830_vm9, %v773_v49, 0.0 }
 0x40a   :  { %v646_v27 = vmul.f32 %v645_v28, %v609_v48  ;;  %v647_v33 = vmul.f32 %v645_v28, %v610_v51 }
 0x40c   :  { %v648_v34 = vmul.f32 %v646_v27, %v522_v38  ;;  %v649_v37 = vmul.f32 %v647_v33, %v523_v39 }
 0x40e   :  { %v650_v35 = vadd.f32 %v648_v34, %v524_v43  ;;  %v651_v36 = vadd.f32 %v649_v37, %v525_v44  ;;  %v2156_v44 = vand.u32 127, %v770_v55 }
 0x410   :  { %735 = vmatmul.f32.gmra.mxu2 %v650_v35  ;;  %v816_v40 = vmul.f32 %v650_v35, %v650_v35  ;;  %758 = vmatmul.f32.gmra.mxu3 %v651_v36  ;;  %v817_v41 = vmul.f32 %v651_v36, %v651_v36 }
 0x412   :  { %v819_v42 = vadd.f32 %v818_v57, %v816_v40  ;;  %v778_v57 = vsel %vm776_vm8, %v2156_v44, 128 }
 0x413   :  { %v781_v58 = vshra.s32 %v778_v57, 16  ;;  %v780_v62 = vand.u32 65535, %v778_v57 }
 0x414   :  { %v820_v45 = vadd.f32 %v819_v42, %v817_v41 }
 0x415   :  { %v783_v59 = vcvt.s32.f32 %v781_v58  ;;  %v782_v17 = vcvt.s32.f32 %v780_v62 }
 0x416   :  { %821 = vadd.xlane.f32.xlu0 %v820_v45 }
 0x489   :  { %v822_v46 = vpop.xlane.xlu0 %821 }
 0x48a   :  { %v823_v47 = vrot.slane %v822_v46, 4 }
 0x48c   :  { %v824_v52 = vadd.f32 %v823_v47, %v822_v46 }
 0x48e   :  { %v825_v53 = vrot.slane %v824_v52, 2 }
 0x490   :  { %v826_v54 = vadd.f32 %v825_v53, %v824_v52 }
 0x492   :  { %v827_v48 = vrot.slane %v826_v54, 1 }
 0x493   :  { %v736_v51 = vpop.f32.mrf.mxu2  ;;  %v759_v38 = vpop.f32.mrf.mxu3 }
 0x494   :  { %v760_v39 = vadd.f32 %v759_v38, %v736_v51  ;;  %v828_v43 = vadd.f32 %v827_v48, %v826_v54 }
 0x496   :  { %v764_v50 = vmul.f32 2.0, %v760_v39  ;;  %1414 = vpush %v828_v43 }
 0x498   :  { %v769_v56 = vsub.f32 %v1449_v16, %v764_v50 }
 0x49a   :  { %774 = vmin.xlane.f32.xlu2 %v769_v56 }
 0x4a2   :  { %784 = vmin.xlane.f32.xlu2 %v783_v59 }
 0x4c7   :  { %s1415_s30 = spop %1414 }
 0x50d   :  { %v775_v60 = vpop.xlane.xlu2 %774 }
 0x50e   :  { %vm777_vm10 = vcmp.eq.f32.partialorder %v769_v56, %v775_v60  ;;  %v832_v31 = vsel %vm830_vm9, %v775_v60, 0.0 }
 0x50f   :  { %v779_v61 = vsel %vm777_vm10, %v2156_v44, 128  ;;  %v833_v30 = vadd.f32 %v832_v31, %v831_v29 }
 0x510   :  { %v795_v32 = vshra.s32 %v779_v61, 16  ;;  %v794_v19 = vand.u32 65535, %v779_v61 }
 0x511   :  { %834 = vadd.xlane.f32.xlu1 %v833_v30 }
 0x512   :  { %v797_v63 = vcvt.s32.f32 %v795_v32  ;;  %v796_v24 = vcvt.s32.f32 %v794_v19 }
 0x514   :  { %798 = vmin.xlane.f32.xlu0 %v797_v63 }
 0x515   :  { %v785_v16 = vpop.xlane.xlu2 %784 }
 0x516   :  { %vm786_vm11 = vcmp.eq.f32.partialorder %v783_v59, %v785_v16  ;;  %v791_v25 = vcvt.f32.s32 %v785_v16 }
 0x517   :  { %v787_v18 = vsel %vm786_vm11, %v782_v17, inf }
 0x518   :  { %v792_v34 = vshll.u32 %v791_v25, 16 }
 0x519   :  { %788 = vmin.xlane.f32.xlu1 %v787_v18 }
 0x584   :  { %v835_v20 = vpop.xlane.xlu1 %834 }
 0x585   :  { %v836_v21 = vrot.slane %v835_v20, 4 }
 0x587   :  { %v837_v22 = vadd.f32 %v836_v21, %v835_v20  ;;  %v799_v23 = vpop.xlane.xlu0 %798 }
 0x588   :  { %vm800_vm12 = vcmp.eq.f32.partialorder %v797_v63, %v799_v23  ;;  %v805_v42 = vcvt.f32.s32 %v799_v23 }
 0x589   :  { %v838_v26 = vrot.slane %v837_v22, 2  ;;  %v801_v28 = vsel %vm800_vm12, %v796_v24, inf }
 0x58a   :  { %802 = vmin.xlane.f32.xlu2 %v801_v28  ;;  %v806_v46 = vshll.u32 %v805_v42, 16 }
 0x58b   :  { %v839_v27 = vadd.f32 %v838_v26, %v837_v22 }
 0x58c   :  { %v789_v33 = vpop.xlane.xlu1 %788 }
 0x58d   :  { %v790_v37 = vcvt.f32.s32 %v789_v33  ;;  %v840_v35 = vrot.slane %v839_v27, 1 }
 0x58f   :  { %v2160_v36 = vadd.s32 %v792_v34, %v790_v37  ;;  %v841_v40 = vadd.f32 %v840_v35, %v839_v27 }
 0x591   :  { %vm808_vm13 = vcmp.eq.s32.totalorder %v2156_v44, %v2160_v36  ;;  %1416 = vpush %v841_v40 }
 0x5c2   :  { %s1417_s25 = spop %1416 }
 0x5c3   :  { %s843_s13 = sadd.f32 %s1417_s25, %s1415_s30 }
 0x5c5   :  { %s844_s26 = smul.f32 0.00024414063, %s843_s13 }
 0x5c7   :  { %v845_v41 = vstv %s844_s26 }
 0x5c8   :  { %847 = vst.msk [vmem:[#allocation21] sm:$0x1] %vm846_vm14, %v845_v41 }
 0x5fd   :  { %v803_v45 = vpop.xlane.xlu2 %802 }
 0x5fe   :  { %v804_v47 = vcvt.f32.s32 %v803_v45 }
 0x600   :  { %v2164_v52 = vadd.s32 %v806_v46, %v804_v47 }
 0x602   :  { %vm809_vm15 = vcmp.eq.s32.totalorder %v2156_v44, %v2164_v52 }
 0x603   :  { %1761 = dma.done.wait [#allocation4], 4096 }
 0x604   :  { %1762 = vsyncadd [#allocation4], 4294963200 }
 0x605   :  { %1763 = dma.done.wait [#allocation4 + $0x1], 2048 }
 0x606   :  { %1764 = vsyncadd [#allocation4 + $0x1], 4294965248  ;;  %v886_v53 = vld [vmem:[#allocation2 + $0xf0] sm:$0xff]  ;;  %v884_v54 = vld [vmem:[#allocation2 + $0xe0] sm:$0xff]  ;;  %v1337_v49 = vunpack.c.h.bf16 %v1940_v7  ;;  %v1336_v48 = vunpack.c.l.bf16 %v1940_v7  ;;  %v1369_v51 = vunpack.c.h.bf16 %v1980_v15  ;;  %v1368_v39 = vunpack.c.l.bf16 %v1980_v15  ;;  %s1194_s22 = sshll.u32 %s2251_s15, 4  ;;  %s1785_s10 = smov [#allocation20]   ;;  %s1195_s22 = int_to_ptr.hbm [resolvable:$true] %s1194_s22 }
 0x607   :  { %v887_v55 = vld [vmem:[#allocation2 + $0xf8] sm:$0xff]  ;;  %888 = vmatpush.msra.mxu0 %v886_v53  ;;  %v885_v38 = vld [vmem:[#allocation2 + $0xe8] sm:$0xff]  ;;  %v882_v43 = vld [vmem:[#allocation2 + $0xd0] sm:$0xff]  ;;  %v1333_v56 = vunpack.c.h.bf16 %v1935_v6  ;;  %v1365_v57 = vunpack.c.h.bf16 %v1975_v14  ;;  %v1332_v7 = vunpack.c.l.bf16 %v1935_v6  ;;  %v1364_v60 = vunpack.c.l.bf16 %v1975_v14  ;;  %s1178_s6 = sshll.u32 %s1785_s10, 4  ;;  %s1180_s30 = sshll.u32 %s2250_s14, 4  ;;  %s1179_s6 = int_to_ptr.vmem [resolvable:$true] %s1178_s6  ;;  %s1181_s30 = int_to_ptr.hbm [resolvable:$true] %s1180_s30 }
 0x608   :  { %911 = vmatpush.msra.mxu1 %v887_v55  ;;  %v883_v50 = vld [vmem:[#allocation2 + $0xd8] sm:$0xff]  ;;  %1006 = vmatpush.msra.mxu2 %v1337_v49  ;;  %v880_v58 = vld [vmem:[#allocation2 + $0xc0] sm:$0xff]  ;;  %v881_v59 = vld [vmem:[#allocation2 + $0xc8] sm:$0xff]  ;;  %v1329_v31 = vunpack.c.h.bf16 %v1930_v5  ;;  %v1361_v61 = vunpack.c.h.bf16 %v1970_v13  ;;  %v1328_v6 = vunpack.c.l.bf16 %v1930_v5  ;;  %v1360_v14 = vunpack.c.l.bf16 %v1970_v13 }
 0x609   :  { %1029 = vmatpush.msra.mxu3 %v1369_v51  ;;  %889 = vmatpush.msra.mxu0 %v884_v54  ;;  %v878_v15 = vld [vmem:[#allocation2 + $0xb0] sm:$0xff]  ;;  %v879_v29 = vld [vmem:[#allocation2 + $0xb8] sm:$0xff]  ;;  %v876_v30 = vld [vmem:[#allocation2 + $0xa0] sm:$0xff]  ;;  %v1325_v16 = vunpack.c.h.bf16 %v1925_v4  ;;  %v1357_v17 = vunpack.c.h.bf16 %v1965_v12  ;;  %v1324_v5 = vunpack.c.l.bf16 %v1925_v4  ;;  %v1356_v13 = vunpack.c.l.bf16 %v1965_v12 }
 0x60a   :  { %912 = vmatpush.msra.mxu1 %v885_v38  ;;  %1007 = vmatpush.msra.mxu2 %v1336_v48  ;;  %v877_v32 = vld [vmem:[#allocation2 + $0xa8] sm:$0xff]  ;;  %v874_v62 = vld [vmem:[#allocation2 + $0x90] sm:$0xff]  ;;  %v875_v63 = vld [vmem:[#allocation2 + $0x98] sm:$0xff]  ;;  %v1321_v22 = vunpack.c.h.bf16 %v1920_v3  ;;  %v1353_v23 = vunpack.c.h.bf16 %v1960_v11  ;;  %v1320_v4 = vunpack.c.l.bf16 %v1920_v3  ;;  %v1352_v12 = vunpack.c.l.bf16 %v1960_v11 }
 0x60b   :  { %1030 = vmatpush.msra.mxu3 %v1368_v39  ;;  %890 = vmatpush.msra.mxu0 %v882_v43  ;;  %v872_v18 = vld [vmem:[#allocation2 + $0x80] sm:$0xff]  ;;  %v873_v19 = vld [vmem:[#allocation2 + $0x88] sm:$0xff]  ;;  %v870_v20 = vld [vmem:[#allocation2 + $0x70] sm:$0xff]  ;;  %v1317_v27 = vunpack.c.h.bf16 %v1915_v2  ;;  %v1349_v33 = vunpack.c.h.bf16 %v1955_v10  ;;  %v1316_v3 = vunpack.c.l.bf16 %v1915_v2  ;;  %v1348_v11 = vunpack.c.l.bf16 %v1955_v10 }
 0x60c   :  { %913 = vmatpush.msra.mxu1 %v883_v50  ;;  %1008 = vmatpush.msra.mxu2 %v1333_v56  ;;  %v871_v21 = vld [vmem:[#allocation2 + $0x78] sm:$0xff]  ;;  %v868_v24 = vld [vmem:[#allocation2 + $0x60] sm:$0xff]  ;;  %v869_v25 = vld [vmem:[#allocation2 + $0x68] sm:$0xff]  ;;  %v1313_v41 = vunpack.c.h.bf16 %v1910_v1  ;;  %v1345_v42 = vunpack.c.h.bf16 %v1950_v9  ;;  %v1312_v2 = vunpack.c.l.bf16 %v1910_v1  ;;  %v1782_v55 = vmov 1.0  }
 0x60d   :  { %1031 = vmatpush.msra.mxu3 %v1365_v57  ;;  %891 = vmatpush.msra.mxu0 %v880_v58  ;;  %v866_v26 = vld [vmem:[#allocation2 + $0x50] sm:$0xff]  ;;  %v867_v28 = vld [vmem:[#allocation2 + $0x58] sm:$0xff]  ;;  %v864_v34 = vld [vmem:[#allocation2 + $0x40] sm:$0xff]  ;;  %v1309_v1 = vunpack.c.h.bf16 %v1905_v0  ;;  %v1344_v49 = vunpack.c.l.bf16 %v1950_v9  ;;  %v1308_v48 = vunpack.c.l.bf16 %v1905_v0  ;;  %v1341_v51 = vunpack.c.h.bf16 %v1945_v8 }
 0x60e   :  { %914 = vmatpush.msra.mxu1 %v881_v59  ;;  %1009 = vmatpush.msra.mxu2 %v1332_v7  ;;  %v865_v37 = vld [vmem:[#allocation2 + $0x48] sm:$0xff]  ;;  %v862_v35 = vld [vmem:[#allocation2 + $0x30] sm:$0xff]  ;;  %v863_v40 = vld [vmem:[#allocation2 + $0x38] sm:$0xff]  ;;  %v1340_v36 = vunpack.c.l.bf16 %v1945_v8 }
 0x60f   :  { %1032 = vmatpush.msra.mxu3 %v1364_v60  ;;  %892 = vmatpush.msra.mxu0 %v878_v15  ;;  %v860_v45 = vld [vmem:[#allocation2 + $0x20] sm:$0xff]  ;;  %v861_v46 = vld [vmem:[#allocation2 + $0x28] sm:$0xff]  ;;  %v858_v10 = vld [vmem:[#allocation2 + $0x10] sm:$0xff]  ;;  %v1783_v15 = vmov 512.0  }
 0x610   :  { %915 = vmatpush.msra.mxu1 %v879_v29  ;;  %1010 = vmatpush.msra.mxu2 %v1329_v31  ;;  %v859_v47 = vld [vmem:[#allocation2 + $0x18] sm:$0xff]  ;;  %v856_v53 = vld [vmem:[#allocation2] sm:$0xff]  ;;  %v857_v54 = vld [vmem:[#allocation2 + $0x8] sm:$0xff]  ;;  %1457 = vrcp.f32 %v1783_v15 }
 0x611   :  { %1033 = vmatpush.msra.mxu3 %v1361_v61  ;;  %893 = vmatpush.msra.mxu0 %v876_v30  ;;  %v1456_v0 = vld [vmem:[#allocation17] ss:$0 sm:$0xff] }
 0x612   :  { %916 = vmatpush.msra.mxu1 %v877_v32  ;;  %1011 = vmatpush.msra.mxu2 %v1328_v6 }
 0x613   :  { %1034 = vmatpush.msra.mxu3 %v1360_v14  ;;  %894 = vmatpush.msra.mxu0 %v874_v62 }
 0x614   :  { %917 = vmatpush.msra.mxu1 %v875_v63  ;;  %1012 = vmatpush.msra.mxu2 %v1325_v16 }
 0x615   :  { %1035 = vmatpush.msra.mxu3 %v1357_v17  ;;  %895 = vmatpush.msra.mxu0 %v872_v18 }
 0x616   :  { %918 = vmatpush.msra.mxu1 %v873_v19  ;;  %1013 = vmatpush.msra.mxu2 %v1324_v5  ;;  %v1458_v29 = vpop.eup %1457 }
 0x617   :  { %1036 = vmatpush.msra.mxu3 %v1356_v13  ;;  %896 = vmatpush.msra.mxu0 %v870_v20  ;;  %v1067_v31 = vmul.f32 512.0, %v1458_v29  ;;  %vm1071_vm1 = vweird.f32 %v1458_v29 }
 0x618   :  { %919 = vmatpush.msra.mxu1 %v871_v21  ;;  %1014 = vmatpush.msra.mxu2 %v1321_v22 }
 0x619   :  { %1037 = vmatpush.msra.mxu3 %v1353_v23  ;;  %897 = vmatpush.msra.mxu0 %v868_v24  ;;  %v1068_v61 = vsub.f32 1.0, %v1067_v31 }
 0x61a   :  { %920 = vmatpush.msra.mxu1 %v869_v25  ;;  %1015 = vmatpush.msra.mxu2 %v1320_v4 }
 0x61b   :  { %1038 = vmatpush.msra.mxu3 %v1352_v12  ;;  %898 = vmatpush.msra.mxu0 %v866_v26  ;;  %v1069_v14 = vmul.f32 %v1458_v29, %v1068_v61 }
 0x61c   :  { %921 = vmatpush.msra.mxu1 %v867_v28  ;;  %1016 = vmatpush.msra.mxu2 %v1317_v27 }
 0x61d   :  { %1039 = vmatpush.msra.mxu3 %v1349_v33  ;;  %899 = vmatpush.msra.mxu0 %v864_v34  ;;  %v1070_v16 = vadd.f32 %v1458_v29, %v1069_v14 }
 0x61e   :  { %922 = vmatpush.msra.mxu1 %v865_v37  ;;  %1017 = vmatpush.msra.mxu2 %v1316_v3 }
 0x61f   :  { %1040 = vmatpush.msra.mxu3 %v1348_v11  ;;  %900 = vmatpush.msra.mxu0 %v862_v35  ;;  %v1072_v19 = vsel %vm1071_vm1, %v1458_v29, %v1070_v16 }
 0x620   :  { %923 = vmatpush.msra.mxu1 %v863_v40  ;;  %1018 = vmatpush.msra.mxu2 %v1313_v41 }
 0x621   :  { %1041 = vmatpush.msra.mxu3 %v1345_v42  ;;  %901 = vmatpush.msra.mxu0 %v860_v45 }
 0x622   :  { %924 = vmatpush.msra.mxu1 %v861_v46  ;;  %1019 = vmatpush.msra.mxu2 %v1312_v2 }
 0x623   :  { %902 = vmatpush.msra.mxu0 %v858_v10  ;;  %1042 = vmatpush.msra.mxu3 %v1344_v49 }
 0x624   :  { %925 = vmatpush.msra.mxu1 %v859_v47  ;;  %1020 = vmatpush.msra.mxu2 %v1309_v1 }
 0x625   :  { %903 = vmatpush.msra.mxu0 %v856_v53  ;;  %1043 = vmatpush.msra.mxu3 %v1341_v51 }
 0x626   :  { %926 = vmatpush.msra.mxu1 %v857_v54  ;;  %1236 = vmatmul.msk.f32.vlgmr.msra.gmra.mxu0 %vm808_vm13, %v1782_v55 }
 0x627   :  { %1238 = vmatmul.msk.f32.vlgmr.msra.gmra.mxu1 %vm808_vm13, %v1782_v55  ;;  %1021 = vmatpush.msra.mxu2 %v1308_v48  ;;  %v1054_v48 = vld [vmem:[%s2248_s12] sm:$0xff]  ;;  %s1784_s12 = smov [#allocation21]  }
 0x628   :  { %1044 = vmatpush.msra.mxu3 %v1340_v36  ;;  %s1192_s4 = sshll.u32 %s1784_s12, 4  ;;  %s1193_s4 = int_to_ptr.vmem [resolvable:$true] %s1192_s4 }
 0x629   :  { %1197 = dma.vmem_to_hbm [thread:$0]  %s1193_s4, 16, %s1195_s22, [#allocation22]  }
 0x62e   :  { %1237 = vmatmul.msk.f32.gmra.mxu0 %vm809_vm15, %v1782_v55 }
 0x62f   :  { %1239 = vmatmul.msk.f32.gmra.mxu1 %vm809_vm15, %v1782_v55 }
 0x6a3   :  { %v905_v38 = vpop.f32.mrf.mxu0 }
 0x6a4   :  { %v928_v39 = vpop.f32.mrf.mxu1  ;;  %v934_v43 = vmax.f32 %v905_v38, 0.0  ;;  %v1055_v38 = vld [vmem:[#allocation19] sm:$0xff] }
 0x6a5   :  { %v935_v44 = vmax.f32 %v928_v39, 0.0 }
 0x6a6   :  { %1022 = vmatmul.f32.vlgmr.msra.gmra.mxu2 %v934_v43 }
 0x6a7   :  { %1045 = vmatmul.f32.vlgmr.msra.gmra.mxu3 %v935_v44 }
 0x6ab   :  { %v908_v52 = vpop.f32.mrf.mxu0 }
 0x6ac   :  { %v931_v50 = vpop.f32.mrf.mxu1  ;;  %v936_v9 = vmax.f32 %v908_v52, 0.0 }
 0x6ad   :  { %v937_v56 = vmax.f32 %v931_v50, 0.0 }
 0x6ae   :  { %1025 = vmatmul.f32.gmra.mxu2 %v936_v9 }
 0x6af   :  { %1048 = vmatmul.f32.gmra.mxu3 %v937_v56 }
 0x729   :  { %v1023_v57 = vpop.f32.mrf.mxu2 }
 0x72a   :  { %v1046_v58 = vpop.f32.mrf.mxu3  ;;  %v1024_v59 = vadd.f32 %v1456_v0, %v1023_v57 }
 0x72c   :  { %v1047_v7 = vadd.f32 %v1046_v58, %v1024_v59 }
 0x72e   :  { %v1052_v60 = vmax.f32 %v1047_v7, 0.0 }
 0x730   :  { %v1056_v8 = vsel %vm267_vm0, %v1052_v60, 0.0 }
 0x731   :  { %1057 = vadd.xlane.f32.xlu0 %v1056_v8  ;;  %v1026_v5 = vpop.f32.mrf.mxu2 }
 0x732   :  { %v1049_v13 = vpop.f32.mrf.mxu3  ;;  %v1027_v20 = vadd.f32 %v1456_v0, %v1026_v5 }
 0x734   :  { %v1050_v21 = vadd.f32 %v1049_v13, %v1027_v20 }
 0x736   :  { %v1053_v22 = vmax.f32 %v1050_v21, 0.0 }
 0x738   :  { %v1115_v23 = vsel %vm267_vm0, %v1053_v22, 0.0 }
 0x739   :  { %1116 = vadd.xlane.f32.xlu1 %v1115_v23 }
 0x7a4   :  { %v1058_v30 = vpop.xlane.xlu0 %1057 }
 0x7a5   :  { %v1059_v32 = vrot.slane %v1058_v30, 4 }
 0x7a7   :  { %v1060_v6 = vadd.f32 %v1059_v32, %v1058_v30 }
 0x7a9   :  { %v1061_v62 = vrot.slane %v1060_v6, 2 }
 0x7ab   :  { %v1062_v63 = vadd.f32 %v1061_v62, %v1060_v6 }
 0x7ac   :  { %v1117_v11 = vpop.xlane.xlu1 %1116 }
 0x7ad   :  { %v1063_v17 = vrot.slane %v1062_v63, 1  ;;  %v1118_v35 = vrot.slane %v1117_v11, 4 }
 0x7af   :  { %v1064_v18 = vadd.f32 %v1063_v17, %v1062_v63  ;;  %v1119_v41 = vadd.f32 %v1118_v35, %v1117_v11 }
 0x7b1   :  { %1418 = vpush %v1064_v18  ;;  %v1120_v42 = vrot.slane %v1119_v41, 2 }
 0x7b2   :  { %1420 = vpush %v1072_v19 }
 0x7b3   :  { %v1121_v10 = vadd.f32 %v1120_v42, %v1119_v41 }
 0x7b5   :  { %v1122_v54 = vrot.slane %v1121_v10, 1 }
 0x7b7   :  { %v1123_v49 = vadd.f32 %v1122_v54, %v1121_v10 }
 0x7e2   :  { %s1419_s11 = spop %1418 }
 0x7e3   :  { %s2214_s29 = spop %1420 }
 0x7e4   :  { %s1074_s1 = smul.f32 %s2214_s29, %s1419_s11 }
 0x7e6   :  { %v1075_v24 = vstv %s1074_s1 }
 0x7e7   :  { %v1076_v25 = vsub.f32 %v1052_v60, %v1075_v24 }
 0x7e9   :  { %v1077_v4 = vmul.f32 %v1076_v25, %v1076_v25 }
 0x7eb   :  { %v1078_v12 = vsel %vm267_vm0, %v1077_v4, 0.0 }
 0x7ec   :  { %1079 = vadd.xlane.f32.xlu0 %v1078_v12 }
 0x85f   :  { %v1080_v26 = vpop.xlane.xlu0 %1079 }
 0x860   :  { %v1081_v28 = vrot.slane %v1080_v26, 4 }
 0x862   :  { %v1082_v27 = vadd.f32 %v1081_v28, %v1080_v26 }
 0x864   :  { %v1083_v33 = vrot.slane %v1082_v27, 2 }
 0x866   :  { %v1084_v34 = vadd.f32 %v1083_v33, %v1082_v27 }
 0x868   :  { %v1085_v37 = vrot.slane %v1084_v34, 1 }
 0x86a   :  { %v1086_v3 = vadd.f32 %v1085_v37, %v1084_v34 }
 0x86c   :  { %1422 = vpush %v1086_v3 }
 0x89d   :  { %s1423_s0 = spop %1422 }
 0x89e   :  { %s1096_s2 = smul.f32 %s1423_s0, %s2214_s29 }
 0x8a0   :  { %s1097_s16 = sadd.f32 1e-05, %s1096_s2 }
 0x8a2   :  { %v1098_v40 = vstv %s1097_s16 }
 0x8a3   :  { %1459 = vrsqrt.f32 %v1098_v40  ;;  %vm1105_vm3 = vweird.f32 %v1098_v40 }
 0x8a9   :  { %v1460_v45 = vpop.eup %1459 }
 0x8aa   :  { %v1100_v46 = vmul.f32 %v1460_v45, %v1098_v40  ;;  %vm1106_vm2 = vweird.f32 %v1460_v45 }
 0x8ab   :  { %vm1107_vm4 = vmor %vm1105_vm3, %vm1106_vm2 }
 0x8ac   :  { %v1101_v2 = vmul.f32 %v1460_v45, %v1100_v46 }
 0x8ae   :  { %v1102_v47 = vmul.f32 0.5, %v1101_v2 }
 0x8b0   :  { %v1103_v53 = vsub.f32 1.5, %v1102_v47 }
 0x8b2   :  { %v1104_v55 = vmul.f32 %v1460_v45, %v1103_v53 }
 0x8b4   :  { %v1108_v1 = vsel %vm1107_vm4, %v1460_v45, %v1104_v55 }
 0x8b5   :  { %1424 = vpush %v1108_v1 }
 0x8b6   :  { %1426 = vpush %v1123_v49 }
 0x8e6   :  { %s1425_s3 = spop %1424 }
 0x8e7   :  { %v1110_v51 = vstv %s1425_s3  ;;  %s1427_s18 = spop %1426 }
 0x8e8   :  { %v1111_v36 = vmul.f32 %v1110_v51, %v1076_v25  ;;  %s1133_s19 = smul.f32 %s1427_s18, %s2214_s29 }
 0x8ea   :  { %v1112_v39 = vmul.f32 %v1111_v36, %v1054_v48  ;;  %v1134_v43 = vstv %s1133_s19 }
 0x8eb   :  { %v1135_v44 = vsub.f32 %v1053_v22, %v1134_v43 }
 0x8ec   :  { %v1113_v52 = vadd.f32 %v1112_v39, %v1055_v38 }
 0x8ed   :  { %v1136_v50 = vmul.f32 %v1135_v44, %v1135_v44 }
 0x8ee   :  { %1114 = vst.msk [vmem:[#allocation20] sm:$0xff] %vm267_vm0, %v1113_v52 }
 0x8ef   :  { %v1137_v9 = vsel %vm267_vm0, %v1136_v50, 0.0 }
 0x8f0   :  { %1138 = vadd.xlane.f32.xlu1 %v1137_v9 }
 0x963   :  { %v1139_v56 = vpop.xlane.xlu1 %1138 }
 0x964   :  { %v1140_v0 = vrot.slane %v1139_v56, 4 }
 0x966   :  { %v1141_v57 = vadd.f32 %v1140_v0, %v1139_v56 }
 0x968   :  { %v1142_v58 = vrot.slane %v1141_v57, 2 }
 0x96a   :  { %v1143_v59 = vadd.f32 %v1142_v58, %v1141_v57 }
 0x96c   :  { %v1144_v7 = vrot.slane %v1143_v59, 1 }
 0x96e   :  { %v1145_v60 = vadd.f32 %v1144_v7, %v1143_v59 }
 0x970   :  { %1428 = vpush %v1145_v60 }
 0x9a1   :  { %s1429_s23 = spop %1428 }
 0x9a2   :  { %s1155_s5 = smul.f32 %s1429_s23, %s2214_s29 }
 0x9a4   :  { %s1156_s7 = sadd.f32 1e-05, %s1155_s5 }
 0x9a6   :  { %v1157_v8 = vstv %s1156_s7 }
 0x9a7   :  { %1461 = vrsqrt.f32 %v1157_v8  ;;  %vm1164_vm6 = vweird.f32 %v1157_v8 }
 0x9ad   :  { %v1462_v15 = vpop.eup %1461 }
 0x9ae   :  { %v1159_v29 = vmul.f32 %v1462_v15, %v1157_v8  ;;  %vm1165_vm5 = vweird.f32 %v1462_v15 }
 0x9af   :  { %vm1166_vm7 = vmor %vm1164_vm6, %vm1165_vm5 }
 0x9b0   :  { %v1160_v31 = vmul.f32 %v1462_v15, %v1159_v29 }
 0x9b2   :  { %v1161_v61 = vmul.f32 0.5, %v1160_v31 }
 0x9b4   :  { %v1162_v30 = vsub.f32 1.5, %v1161_v61 }
 0x9b6   :  { %v1163_v32 = vmul.f32 %v1462_v15, %v1162_v30 }
 0x9b8   :  { %v1167_v6 = vsel %vm1166_vm7, %v1462_v15, %v1163_v32 }
 0x9b9   :  { %1430 = vpush %v1167_v6 }
 0x9ea   :  { %s1431_s15 = spop %1430 }
 0x9eb   :  { %v1169_v14 = vstv %s1431_s15 }
 0x9ec   :  { %v1170_v62 = vmul.f32 %v1169_v14, %v1135_v44 }
 0x9ee   :  { %v1171_v63 = vmul.f32 %v1170_v62, %v1054_v48 }
 0x9f0   :  { %v1172_v16 = vadd.f32 %v1171_v63, %v1055_v38 }
 0x9f2   :  { %1173 = vst.msk [vmem:[#allocation20 + $0x8] sm:$0xff] %vm267_vm0, %v1172_v16 }
 0x9f3   :  { %1186 = dma.vmem_to_hbm [thread:$0]  %s1179_s6, 256, %s1181_s30, [#allocation7], %s1774_s27, %s1774_s27, %s1775_s28  }
 0x9f4   :  { %1765 = dma.done.wait [#allocation7], 256  }
 0x9f5   :  { %1766 = vsyncadd [#allocation7], 4294967040 }
 0x9f6   :  { %1767 = dma.done.wait [#allocation22], 16  }
 0x9f7   :  { %1768 = vsyncadd [#allocation22], 4294967280 }
 0x9f8   :  { %1206 = vsyncpa [#allocation6], 1 }
 0x9f9   :  { %1207 = vsyncpa [#allocation9], 1 }
 0x9fa   :  { %1208 = vsyncpa [#allocation12], 1 }
 0x9fb   :  { %1209 = vsyncpa [#allocation15], 1 }
 0x9fc   :  { %1210 = vsyncpa [#allocation18], 1 }
 0x9fd   :  { %1211 = vsyncpa [#allocation7], 1 }
 0x9fe   :  { %1212 = vsyncpa [#allocation22], 1 }
 0x9ff   :  { %1213 = vsyncmov [#allocation4] }
 0xa02   :  { %s1214_s14 = vpop.sfrf %1213 }
 0xa03   :  { %p1240_p0 = scmp.ne.s32.totalorder %s1214_s14, 0 }
 0xa05   :  { %1218 = shalt.err (%p1240_p0)  }
 0xa06   :  { %1220 = vsyncmov [#allocation4 + $0x1] }
 0xa09   :  { %s1221_s25 = vpop.sfrf %1220 }
 0xa0a   :  { %p1241_p1 = scmp.ne.s32.totalorder %s1221_s25, 0 }
 0xa0c   :  { %1225 = shalt.err (%p1241_p1)  }

</bundles_post_ra>
